<compile_context>
chip_gen: v6e
topology: v6e:2x2x1
jax: 0.10.0
libtpu: 0.0.40
codegen_flags: <defaults>
</compile_context>

<pallas_src>
import jax
import jax.numpy as jnp
from jax import lax
from jax.experimental import pallas as pl
from jax.experimental.pallas import tpu as pltpu

IMG_H = 16
IMG_W = 16
HW = IMG_H * IMG_W                    # 256 pixels per image
HIDDEN = 8
NUM_CLASSES = 5

BATCH = 8                             # images per inference call
TOTAL_PIX = BATCH * HW                # 2048 lanes, single block


def _shift_for_tap(oy, ox):
    """jnp.roll-style lane shift that brings pixel (h+oy, w+ox) to lane (h, w)."""
    return (-(oy * IMG_W + ox)) % TOTAL_PIX


# ----------------------------------------------------------------------------------------------
# One-off probe: determine the per-sublane stride sign of pltpu.roll (or detect that the strided
# form is unavailable).  Keeps the strided-roll im2col correct regardless of the convention.
# ----------------------------------------------------------------------------------------------
def _roll_probe_kernel(o_ref):
    lane = lax.broadcasted_iota(jnp.int32, (3, TOTAL_PIX), 1).astype(jnp.float32)
    o_ref[...] = pltpu.roll(lane, shift=0, axis=1, stride=1, stride_axis=0)


def _detect_strided_roll_dir():
    """+1 if effective shift = base + sublane*stride, -1 if base - sublane*stride, 0 = fallback."""
    try:
        out = pl.pallas_call(
            _roll_probe_kernel,
            out_shape=jax.ShapeDtypeStruct((3, TOTAL_PIX), jnp.float32),
            out_specs=pl.BlockSpec(memory_space=pltpu.MemorySpace.VMEM),
        )()
        eff = [int(v) for v in (-out[:, 0].astype(jnp.int32)) % TOTAL_PIX]
    except Exception:
        return 0
    if eff == [0, 1, 2]:
        return 1
    if eff == [0, TOTAL_PIX - 1, TOTAL_PIX - 2]:
        return -1
    return 0


# ----------------------------------------------------------------------------------------------
# Kernel
# ----------------------------------------------------------------------------------------------
def _make_kernel(use_strided, tap_list, base_up, base_dn):
    def seg_head_kernel(x_ref, m_ref, ws_ref, wc_ref, bmap_ref, w2_ref, b2_ref, seg_ref):
        # x_ref    : (1, TOTAL_PIX)        u8  raw pixels, images concatenated on lanes
        # m_ref    : (8, TOTAL_PIX)        f32 per-tap in-bounds masks (center tap excluded)
        # ws_ref   : (HIDDEN, 8)           f32 folded 3x3 weights (center column removed)
        # wc_ref   : (HIDDEN, 1)           f32 folded center-tap weights (mask always 1)
        # bmap_ref : (HIDDEN, TOTAL_PIX)   f32 constant normalization + bias map
        # w2_ref   : (NUM_CLASSES, HIDDEN) f32 1x1 conv weights
        # b2_ref   : (NUM_CLASSES, 1)      f32 1x1 conv bias column
        # seg_ref  : (1, TOTAL_PIX)        u8  per-pixel argmax class index
        g = x_ref[...].astype(jnp.int32).astype(jnp.float32)        # u8 -> f32 in-kernel

        # im2col via cyclic lane rolls; wrap-around / out-of-image taps are zeroed by the mask.
        if use_strided:
            g3 = jnp.broadcast_to(g, (3, TOTAL_PIX))
            up = pltpu.roll(g3, shift=base_up, axis=1, stride=1, stride_axis=0)   # oy = -1 taps
            dn = pltpu.roll(g3, shift=base_dn, axis=1, stride=1, stride_axis=0)   # oy = +1 taps
            lft = pltpu.roll(g, shift=_shift_for_tap(0, -1), axis=1)              # (0, -1)
            rgt = pltpu.roll(g, shift=_shift_for_tap(0, 1), axis=1)               # (0, +1)
            S = jnp.concatenate([up, lft, rgt, dn], axis=0)                       # (8, N)
        else:
            S = jnp.concatenate(
                [pltpu.roll(g, shift=_shift_for_tap(oy, ox), axis=1) for oy, ox in tap_list],
                axis=0)                                                           # (8, N)
        S = S * m_ref[...]

        # conv1 (3x3 SAME) with /255 + ImageNet normalization folded in, then ReLU.
        # Center tap is a rank-1 broadcast (no roll, mask == 1).
        h1 = (jnp.dot(ws_ref[...], S, preferred_element_type=jnp.float32)
              + wc_ref[...] * g + bmap_ref[...])
        h1 = jnp.maximum(h1, 0.0)                                                 # (HIDDEN, N)

        # conv2 (1x1) fused into ONE matmul, bias as a single broadcast-add.
        logits = jnp.dot(w2_ref[...], h1, preferred_element_type=jnp.float32) + b2_ref[...]

        # reverse_one_hot_uint8: argmax over classes (first index wins on ties) as uint8.
        maxv = jnp.max(logits, axis=0, keepdims=True)                             # (1, N)
        cls = lax.broadcasted_iota(jnp.int32, (NUM_CLASSES, TOTAL_PIX), 0).astype(jnp.float32)
        idx = jnp.min(jnp.where(logits >= maxv, cls, jnp.float32(NUM_CLASSES)),
                      axis=0, keepdims=True)                                      # (1, N)
        seg_ref[...] = idx.astype(jnp.int32).astype(jnp.uint8)

    return seg_head_kernel


# ----------------------------------------------------------------------------------------------
# Host-side constant folding + pallas_call wrapper
# ----------------------------------------------------------------------------------------------
def make_inference_fn(w1, b1, w2, b2, mean, std):
    """Fold all static constants once; return a jitted (B,H,W) u8 -> (B,H,W) u8 inference fn."""
    a = 1.0 / (255.0 * std)                        # /255 + 1/std, per input channel
    boff = -mean / std
    w1r = w1.reshape(HIDDEN, 3, 9)                 # (O, C, Kh*Kw), k = (oy+1)*3 + (ox+1)
    w_all = jnp.einsum("ock,c->ok", w1r, a)        # (HIDDEN, 9) folded scale weights
    w_m = jnp.einsum("ock,c->ok", w1r, boff)       # (HIDDEN, 9) folded mean-offset weights

    # Static per-image in-bounds mask per tap (SAME padding of the *normalized* tensor,
    # so padded taps contribute exactly 0 after folding).
    hh = jnp.arange(HW) // IMG_W
    ww = jnp.arange(HW) % IMG_W
    m_rows = []
    for oy in (-1, 0, 1):
        for ox in (-1, 0, 1):
            m_rows.append(((hh + oy >= 0) & (hh + oy < IMG_H) &
                           (ww + ox >= 0) & (ww + ox < IMG_W)).astype(jnp.float32))
    m_img9 = jnp.stack(m_rows, axis=0)             # (9, HW)
    b_img = w_m @ m_img9 + b1[:, None]             # (HIDDEN, HW) constant bias map

    # Calibrate the strided-roll layout (or fall back to per-row rolls).
    sdir = _detect_strided_roll_dir()
    if sdir == 1:          # effective shift = base + sublane
        up_taps = [(-1, 1), (-1, 0), (-1, -1)]
        dn_taps = [(1, 1), (1, 0), (1, -1)]
    else:                  # sdir == -1 (base - sublane) or fallback (natural order)
        up_taps = [(-1, -1), (-1, 0), (-1, 1)]
        dn_taps = [(1, -1), (1, 0), (1, 1)]
    tap_list = up_taps + [(0, -1), (0, 1)] + dn_taps          # 8 taps, center excluded
    base_up = _shift_for_tap(*up_taps[0])
    base_dn = _shift_for_tap(*dn_taps[0])

    tap9 = jnp.array([(oy + 1) * 3 + (ox + 1) for oy, ox in tap_list])
    w_s8 = w_all[:, tap9]                          # (HIDDEN, 8)
    w_c = w_all[:, 4:5]                            # (HIDDEN, 1) center tap
    m8 = jnp.tile(m_img9[tap9, :], (1, BATCH))     # (8, TOTAL_PIX)
    bmap = jnp.tile(b_img, (1, BATCH))             # (HIDDEN, TOTAL_PIX)
    b2c = b2.reshape(NUM_CLASSES, 1)

    # TODO(synk): at realistic image sizes, tile the pixel axis with a grid (CORE_PARALLEL only
    # on v7x), regenerate the border mask in-kernel (iota + compares) instead of streaming it,
    # cast the matmul operands to bf16 on v6e/v7x, and set vmem_limit_bytes (v5e default scoped
    # VMEM is 16 MiB, v7x physical VMEM is 64 MiB).  Not needed at 16x16 / 2048 pixels.
    vmem = pl.BlockSpec(memory_space=pltpu.MemorySpace.VMEM)
    kernel_call = pl.pallas_call(
        _make_kernel(sdir != 0, tap_list, base_up, base_dn),
        out_shape=jax.ShapeDtypeStruct((1, TOTAL_PIX), jnp.uint8),
        in_specs=[vmem] * 7,
        out_specs=vmem,
    )

    @jax.jit
    def infer(x_batch):                            # (BATCH, H, W) uint8
        x_flat = x_batch.reshape(1, TOTAL_PIX)     # stays uint8; converted to f32 in-kernel
        seg = kernel_call(x_flat, m8, w_s8, w_c, bmap, w2, b2c)
        return seg.reshape(BATCH, IMG_H, IMG_W)    # reverse_one_hot_uint8 result

    return infer


def reference_logits(x_batch, mean, std, w1, b1, w2, b2):
    """Pure-JAX reference of preprocess + inner module (for validation)."""
    g = x_batch.astype(jnp.float32) / 255.0                        # (B, H, W)
    xn = jnp.stack([g, g, g], axis=1)                              # (B, 3, H, W)
    xn = (xn - mean[None, :, None, None]) / std[None, :, None, None]
    h = lax.conv_general_dilated(xn, w1, (1, 1), "SAME",
                                 dimension_numbers=("NCHW", "OIHW", "NCHW"))
    h = jnp.maximum(h + b1[None, :, None, None], 0.0)
    logits = jnp.einsum("oh,bhxy->boxy", w2, h) + b2[None, :, None, None]
    return logits                                                  # (B, NUM_CLASSES, H, W)


# TODO(synk): the tuple/dict output branches (decode_viz_mask, local_map_rl/rr,
# visibility_mask/grid, main_flow, lane_attractor) depend on helpers not defined in the
# reference module; with a single-tensor inner module only the tensor branch runs.

if __name__ == "__main__":
    key = jax.random.PRNGKey(0)
    k_img, k_w1, k_b1, k_w2, k_b2 = jax.random.split(key, 5)

    x_batch = jax.random.randint(
        k_img, (BATCH, IMG_H, IMG_W), 0, 256, dtype=jnp.int32).astype(jnp.uint8)
    mean = jnp.array([0.485, 0.456, 0.406], jnp.float32)
    std = jnp.array([0.229, 0.224, 0.225], jnp.float32)
    w1 = jax.random.normal(k_w1, (HIDDEN, 3, 3, 3), jnp.float32) * 0.25
    b1 = jax.random.normal(k_b1, (HIDDEN,), jnp.float32) * 0.05
    w2 = jax.random.normal(k_w2, (NUM_CLASSES, HIDDEN), jnp.float32) * 0.25
    b2 = jax.random.normal(k_b2, (NUM_CLASSES,), jnp.float32) * 0.05

    infer = make_inference_fn(w1, b1, w2, b2, mean, std)
    seg = jax.block_until_ready(infer(x_batch))
    assert seg.shape == (BATCH, IMG_H, IMG_W) and seg.dtype == jnp.uint8

    # Validate: the chosen class must be within 1e-3 of the reference max logit at every pixel
    # (tolerant to float-accumulation noise; first-index-wins on exact ties).
    ref = reference_logits(x_batch, mean, std, w1, b1, w2, b2).reshape(BATCH, NUM_CLASSES, HW)
    chosen = jnp.take_along_axis(
        ref, seg.reshape(BATCH, 1, HW).astype(jnp.int32), axis=1)[:, 0, :]
    assert bool(jnp.all(chosen >= ref.max(axis=1) - 1e-3)), "segmentation mismatch"

    print("KERNEL_OK")
</pallas_src>

<mosaic_0001>
module attributes {stable_mosaic.version = 11 : i64} {
  func.func @seg_head_kernel(%arg0: memref<1x2048xi8, #tpu.memory_space<vmem>>, %arg1: memref<8x2048xf32, #tpu.memory_space<vmem>>, %arg2: memref<8x8xf32, #tpu.memory_space<vmem>>, %arg3: memref<8x1xf32, #tpu.memory_space<vmem>>, %arg4: memref<8x2048xf32, #tpu.memory_space<vmem>>, %arg5: memref<5x8xf32, #tpu.memory_space<vmem>>, %arg6: memref<5x1xf32, #tpu.memory_space<vmem>>, %arg7: memref<1x2048xi8, #tpu.memory_space<vmem>>) attributes {dimension_semantics = [], scalar_prefetch = 0 : i64, scratch_operands = 0 : i64, tpu.core_type = #tpu.core_type<tc>} {
    %c0 = arith.constant 0 : index
    %c0_0 = arith.constant 0 : index
    %0 = vector.load %arg0[%c0, %c0_0] : memref<1x2048xi8, #tpu.memory_space<vmem>>, vector<1x2048xi8>
    %1 = arith.extui %0 : vector<1x2048xi8> to vector<1x2048xi32>
    %2 = arith.sitofp %1 : vector<1x2048xi32> to vector<1x2048xf32>
    %c17_i32 = arith.constant 17 : i32
    %3 = tpu.dynamic_rotate %2 by %c17_i32 dim 1 : vector<1x2048xf32>, i32 -> vector<1x2048xf32>
    %c16_i32 = arith.constant 16 : i32
    %4 = tpu.dynamic_rotate %2 by %c16_i32 dim 1 : vector<1x2048xf32>, i32 -> vector<1x2048xf32>
    %c15_i32 = arith.constant 15 : i32
    %5 = tpu.dynamic_rotate %2 by %c15_i32 dim 1 : vector<1x2048xf32>, i32 -> vector<1x2048xf32>
    %c1_i32 = arith.constant 1 : i32
    %6 = tpu.dynamic_rotate %2 by %c1_i32 dim 1 : vector<1x2048xf32>, i32 -> vector<1x2048xf32>
    %c2047_i32 = arith.constant 2047 : i32
    %7 = tpu.dynamic_rotate %2 by %c2047_i32 dim 1 : vector<1x2048xf32>, i32 -> vector<1x2048xf32>
    %c2033_i32 = arith.constant 2033 : i32
    %8 = tpu.dynamic_rotate %2 by %c2033_i32 dim 1 : vector<1x2048xf32>, i32 -> vector<1x2048xf32>
    %c2032_i32 = arith.constant 2032 : i32
    %9 = tpu.dynamic_rotate %2 by %c2032_i32 dim 1 : vector<1x2048xf32>, i32 -> vector<1x2048xf32>
    %c2031_i32 = arith.constant 2031 : i32
    %10 = tpu.dynamic_rotate %2 by %c2031_i32 dim 1 : vector<1x2048xf32>, i32 -> vector<1x2048xf32>
    %11 = tpu.concatenate %3, %4, %5, %6, %7, %8, %9, %10 in 0 : vector<1x2048xf32>, vector<1x2048xf32>, vector<1x2048xf32>, vector<1x2048xf32>, vector<1x2048xf32>, vector<1x2048xf32>, vector<1x2048xf32>, vector<1x2048xf32> -> vector<8x2048xf32>
    %c0_1 = arith.constant 0 : index
    %c0_2 = arith.constant 0 : index
    %12 = vector.load %arg1[%c0_1, %c0_2] : memref<8x2048xf32, #tpu.memory_space<vmem>>, vector<8x2048xf32>
    %13 = arith.mulf %11, %12 : vector<8x2048xf32>
    %c0_3 = arith.constant 0 : index
    %c0_4 = arith.constant 0 : index
    %14 = vector.load %arg2[%c0_3, %c0_4] : memref<8x8xf32, #tpu.memory_space<vmem>>, vector<8x8xf32>
    %cst = arith.constant dense<0.000000e+00> : vector<8x2048xf32>
    %15 = tpu.matmul %14, %13, %cst {dimension_numbers = #tpu.dot_dimension_numbers<[1], [0], [0], [1], [0, 0, 1, 1], [], []>} : vector<8x8xf32>, vector<8x2048xf32>, vector<8x2048xf32> -> vector<8x2048xf32>
    %c0_5 = arith.constant 0 : index
    %c0_6 = arith.constant 0 : index
    %16 = vector.load %arg3[%c0_5, %c0_6] : memref<8x1xf32, #tpu.memory_space<vmem>>, vector<8x1xf32>
    %17 = vector.broadcast %16 : vector<8x1xf32> to vector<8x2048xf32>
    %18 = vector.broadcast %2 : vector<1x2048xf32> to vector<8x2048xf32>
    %19 = arith.mulf %17, %18 : vector<8x2048xf32>
    %20 = arith.addf %15, %19 : vector<8x2048xf32>
    %c0_7 = arith.constant 0 : index
    %c0_8 = arith.constant 0 : index
    %21 = vector.load %arg4[%c0_7, %c0_8] : memref<8x2048xf32, #tpu.memory_space<vmem>>, vector<8x2048xf32>
    %22 = arith.addf %20, %21 : vector<8x2048xf32>
    %cst_9 = arith.constant 0.000000e+00 : f32
    %23 = vector.broadcast %cst_9 : f32 to vector<8x2048xf32>
    %24 = arith.maximumf %22, %23 : vector<8x2048xf32>
    %c0_10 = arith.constant 0 : index
    %c0_11 = arith.constant 0 : index
    %25 = vector.load %arg5[%c0_10, %c0_11] : memref<5x8xf32, #tpu.memory_space<vmem>>, vector<5x8xf32>
    %cst_12 = arith.constant dense<0.000000e+00> : vector<5x2048xf32>
    %26 = tpu.matmul %25, %24, %cst_12 {dimension_numbers = #tpu.dot_dimension_numbers<[1], [0], [0], [1], [0, 0, 1, 1], [], []>} : vector<5x8xf32>, vector<8x2048xf32>, vector<5x2048xf32> -> vector<5x2048xf32>
    %c0_13 = arith.constant 0 : index
    %c0_14 = arith.constant 0 : index
    %27 = vector.load %arg6[%c0_13, %c0_14] : memref<5x1xf32, #tpu.memory_space<vmem>>, vector<5x1xf32>
    %28 = vector.broadcast %27 : vector<5x1xf32> to vector<5x2048xf32>
    %29 = arith.addf %26, %28 : vector<5x2048xf32>
    %cst_15 = arith.constant dense<0xFF800000> : vector<2048xf32>
    %30 = vector.multi_reduction <maximumf>, %29, %cst_15 [0] : vector<5x2048xf32> to vector<2048xf32>
    %31 = vector.shape_cast %30 : vector<2048xf32> to vector<1x2048xf32>
    %32 = tpu.iota {dimensions = array<i32: 0>} : vector<5x2048xi32>
    %33 = arith.sitofp %32 : vector<5x2048xi32> to vector<5x2048xf32>
    %34 = vector.broadcast %31 : vector<1x2048xf32> to vector<5x2048xf32>
    %35 = arith.cmpf oge, %29, %34 : vector<5x2048xf32>
    %cst_16 = arith.constant 5.000000e+00 : f32
    %36 = vector.broadcast %cst_16 : f32 to vector<5x2048xf32>
    %37 = arith.select %35, %33, %36 : vector<5x2048xi1>, vector<5x2048xf32>
    %cst_17 = arith.constant dense<0x7F800000> : vector<2048xf32>
    %38 = vector.multi_reduction <minimumf>, %37, %cst_17 [0] : vector<5x2048xf32> to vector<2048xf32>
    %39 = vector.shape_cast %38 : vector<2048xf32> to vector<1x2048xf32>
    %40 = arith.fptosi %39 : vector<1x2048xf32> to vector<1x2048xi32>
    %41 = arith.trunci %40 : vector<1x2048xi32> to vector<1x2048xi8>
    %c0_18 = arith.constant 0 : index
    %c0_19 = arith.constant 0 : index
    %42 = vector.load %arg7[%c0_18, %c0_19] : memref<1x2048xi8, #tpu.memory_space<vmem>>, vector<1x2048xi8>
    tpu.vector_store %arg7[%c0_18, %c0_19], %41 {strides = array<i32>} : memref<1x2048xi8, #tpu.memory_space<vmem>>, vector<1x2048xi8>,
    return
  }
}

</mosaic_0001>

<bundles_post_ra>
// kernel: infer.1
= control target key start
LH: loop header
LB: loop body
LE: loop exit
PB: predicated region body
PF: predicated region fallthrough
CT: control target
= control target key end

     0   :  { %12 = vsyncpa [#allocation3], 0  ;;  %s4294_s0 = inlined_call_operand.vmem [shape: u8[1,2048], index: 0, kind: input, shape index: {}]   ;;  %s4295_s1 = inlined_call_operand.hbm [shape: f32[8,2048], index: 1, kind: input, shape index: {}]   ;;  %s4296_s2 = inlined_call_operand.vmem [shape: f32[8,8], index: 2, kind: input, shape index: {}]   ;;  %s4297_s3 = inlined_call_operand.vmem [shape: f32[8,1], index: 3, kind: input, shape index: {}]   ;;  %s4298_s4 = inlined_call_operand.hbm [shape: f32[8,2048], index: 4, kind: input, shape index: {}]   ;;  %s4299_s5 = inlined_call_operand.vmem [shape: f32[5,8], index: 5, kind: input, shape index: {}]   ;;  %s4300_s6 = inlined_call_operand.vmem [shape: f32[5,1], index: 6, kind: input, shape index: {}]   ;;  %s4301_s7 = inlined_call_operand.vmem [shape: u8[1,2048], index: 7, kind: output, shape index: {}]  }
   0x1   :  { %13 = vsyncpa [#allocation5], 0  ;;  %s2893_s24 = smov [#allocation2]   ;;  %s2894_s26 = smov [#allocation4]  }
   0x2   :  { %s22_s25 = sshll.u32 %s2893_s24, 4  ;;  %s36_s27 = sshll.u32 %s2894_s26, 4  ;;  %s23_s25 = int_to_ptr.vmem [resolvable:$true] %s22_s25  ;;  %s37_s27 = int_to_ptr.vmem [resolvable:$true] %s36_s27 }
   0x3   :  { %s2857_s28 = scalar_lea.vmem %s23_s25, 2048  ;;  %p2862_p1 = scmp.lt.s32.totalorder %s23_s25, %s23_s25 }
   0x4   :  { %p2858_p0 = scmp.ne.s32.totalorder %s23_s25, %s2857_s28  ;;  %p2863_p2 = scmp.lt.s32.totalorder %s2857_s28, %s2857_s28 }
   0x6   :  { %p2864_p3 = por %p2863_p2, %p2862_p1 }
   0x8   :  { %p2865_p4 = pnand %p2864_p3, %p2858_p0 }
   0xa   :  { %2868 = shalt.err (!%p2865_p4)
}
   0xb   :  { %25 = dma.hbm_to_vmem [thread:$0]  %s4295_s1, 2048, %s23_s25, [#allocation3]  }
   0xc   :  { %s2877_s8 = scalar_lea.vmem %s37_s27, 2048  ;;  %p2882_p6 = scmp.lt.s32.totalorder %s37_s27, %s37_s27 }
   0xd   :  { %p2878_p5 = scmp.ne.s32.totalorder %s37_s27, %s2877_s8  ;;  %p2883_p7 = scmp.lt.s32.totalorder %s2877_s8, %s2877_s8 }
   0xf   :  { %p2884_p8 = por %p2883_p7, %p2882_p6 }
  0x11   :  { %p2885_p9 = pnand %p2884_p8, %p2878_p5 }
  0x13   :  { %2888 = shalt.err (!%p2885_p9)
}
  0x14   :  { %39 = dma.hbm_to_vmem [thread:$0]  %s4298_s4, 2048, %s37_s27, [#allocation5]  }
  0x15   :  { %2889 = dma.done.wait [#allocation3], 2048  }
  0x16   :  { %2890 = vsyncadd [#allocation3], 4294965248 }
  0x17   :  { %2891 = dma.done.wait [#allocation5], 2048  }
  0x18   :  { %2892 = vsyncadd [#allocation5], 4294965248  ;;  %v84_v0 = vlaneseq  ;;  %v50_v2 = vld [vmem:[%s4294_s0] sm:$0xff]  ;;  %v2961_v3 = vld [vmem:[%s4294_s0 + $0x8] sm:$0xff]  ;;  %s2895_s0 = smov 16   ;;  %s2896_s4 = smov 15  }
  0x19   :  { %v53_v4 = vunpack.c.1.s8 %v50_v2  ;;  %v52_v5 = vunpack.c.0.s8 %v50_v2  ;;  %v59_v6 = vunpack.c.3.s8 %v2961_v3  ;;  %v56_v7 = vunpack.c.0.s8 %v2961_v3  ;;  %s2897_s14 = smov 17   ;;  %s2898_s15 = smov 1  }
  0x1a   :  { %v2953_v1 = vshrl.u32 %v84_v0, 7  ;;  %v57_v8 = vunpack.c.1.s8 %v2961_v3  ;;  %v54_v28 = vunpack.c.2.s8 %v50_v2  ;;  %v55_v31 = vunpack.c.3.s8 %v50_v2  ;;  %s2899_s16 = smov 127   ;;  %s2900_s17 = smov 113  }
  0x1b   :  { %v61_v9 = vand.u32 255, %v53_v4  ;;  %v60_v11 = vand.u32 255, %v52_v5  ;;  %v2969_v12 = vand.u32 255, %v56_v7  ;;  %v2974_v17 = vand.u32 255, %v59_v6  ;;  %s2901_s18 = smov 112   ;;  %s2902_s19 = smov 111  }
  0x1c   :  { %4316 = vst [vmem:[#allocation8_spill] sm:$0xff] %v2953_v1  ;;  %v2967_v10 = vsub.s32 0, %v2953_v1  ;;  %v2971_v13 = vand.u32 255, %v57_v8  ;;  %v90_v16 = vsub.s32 4, %v2953_v1  ;;  %v62_v29 = vand.u32 255, %v54_v28 }
  0x1d   :  { %v69_v14 = vcvt.s32.f32 %v61_v9  ;;  %v68_v15 = vcvt.s32.f32 %v60_v11  ;;  %v72_v21 = vcvt.s32.f32 %v2969_v12  ;;  %v75_v24 = vcvt.s32.f32 %v2974_v17 }
  0x1e   :  { %v73_v18 = vcvt.s32.f32 %v2971_v13  ;;  %v70_v30 = vcvt.s32.f32 %v62_v29  ;;  %v63_v33 = vand.u32 255, %v55_v31  ;;  %v58_v36 = vunpack.c.2.s8 %v2961_v3 }
  0x1f   :  { %v2978_v19 = vrot.slane %v69_v14, %v2967_v10  ;;  %v2981_v20 = vrot.slane %v68_v15, %v2967_v10  ;;  %v2988_v22 = vrot.slane %v69_v14, %v90_v16  ;;  %v2990_v23 = vrot.slane %v68_v15, %v90_v16 }
  0x20   :  { %v2995_v25 = vrot.slane %v72_v21, %v90_v16  ;;  %v2999_v26 = vrot.slane %v73_v18, %v90_v16  ;;  %v3007_v27 = vrot.slane %v75_v24, %v90_v16  ;;  %v3046_v32 = vrot.slane %v70_v30, %v2967_v10 }
  0x21   :  { %4317 = vst [vmem:[#allocation9_spill] sm:$0xff] %v2981_v20  ;;  %219 = vrot.lane.b32.xlu1 %v2978_v19, %s2895_s0  ;;  %215 = vrot.lane.b32.xlu0 %v2981_v20, %s2895_s0  ;;  %4318 = vst [vmem:[#allocation10_spill] sm:$0xff] %v2988_v22  ;;  %v3052_v34 = vrot.slane %v70_v30, %v90_v16  ;;  %v71_v35 = vcvt.s32.f32 %v63_v33  ;;  %v3064_v39 = vand.u32 255, %v58_v36  ;;  %v4302_v6 = vmov 0.0  }
  0x22   :  { %4319 = vst [vmem:[#allocation11_spill] sm:$0xff] %v2990_v23  ;;  %4320 = vst [vmem:[#allocation12_spill] sm:$0xff] %v3007_v27  ;;  %v3138_v42 = vrot.slane %v72_v21, %v2967_v10  ;;  %v3159_v47 = vrot.slane %v73_v18, %v2967_v10  ;;  %1200 = vmatprep.mubr.f32.mxu0 %v4302_v6  ;;  %1271 = vmatprep.mubr.f32.mxu1 %v4302_v6  ;;  %v3277_v28 = vand.u32 127, %v84_v0  ;;  %vm894_vm3 = vcmask 1040384  }
  0x23   :  { %4321 = vst [vmem:[#allocation13_spill] sm:$0xff] %v3046_v32  ;;  %4322 = vst [vmem:[#allocation14_spill] sm:$0xff] %v3052_v34  ;;  %v3059_v37 = vrot.slane %v71_v35, %v90_v16  ;;  %v3062_v38 = vrot.slane %v71_v35, %v2967_v10  ;;  %v74_v40 = vcvt.s32.f32 %v3064_v39  ;;  %v3297_v0 = vrot.slane %v75_v24, %v2967_v10 }
  0x24   :  { %4326 = vst [vmem:[#allocation18_spill] sm:$0xff] %v3138_v42  ;;  %vm296_vm0 = vcmp.lt.s32.totalorder %v3277_v28, 15  ;;  %vm247_vm1 = vcmp.lt.s32.totalorder %v3277_v28, 16  ;;  %vm198_vm2 = vcmp.lt.s32.totalorder %v3277_v28, 17  ;;  %vm911_vm4 = vcmask 1041408  }
  0x25   :  { %221 = vrot.lane.b32.xlu1 %v2988_v22, %s2895_s0  ;;  %217 = vrot.lane.b32.xlu0 %v2990_v23, %s2895_s0  ;;  %4323 = vst [vmem:[#allocation15_spill] sm:$0xff] %v3059_v37  ;;  %4324 = vst [vmem:[#allocation16_spill] sm:$0xff] %v3062_v38  ;;  %v3073_v41 = vrot.slane %v74_v40, %v90_v16  ;;  %v3272_v16 = vrot.slane %v74_v40, %v2967_v10  ;;  %vm345_vm5 = vcmp.lt.s32.totalorder %v3277_v28, 1  ;;  %vm928_vm6 = vcmask 1042432  }
  0x26   :  { %vm394_vm7 = vcmp.lt.s32.totalorder %v3277_v28, 127  ;;  %vm443_vm8 = vcmp.lt.s32.totalorder %v3277_v28, 113  ;;  %vm492_vm9 = vcmp.lt.s32.totalorder %v3277_v28, 112  ;;  %vm945_vm10 = vcmask 1043456  }
  0x27   :  { %4325 = vst [vmem:[#allocation17_spill] sm:$0xff] %v3073_v41  ;;  %vm541_vm11 = vcmp.lt.s32.totalorder %v3277_v28, 111  ;;  %vm962_vm12 = vcmask 1044480   ;;  %vm979_vm13 = vcmask 1045504   ;;  %vm996_vm14 = vcmask 1046528  }
  0x28   :  { %vm1132_vm15 = vcmask 64512  }
  0x29   :  { %264 = vrot.lane.b32.xlu1 %v2981_v20, %s2896_s4  ;;  %245 = vrot.lane.b32.xlu0 %v3007_v27, %s2895_s0 }
  0x2d   :  { %268 = vrot.lane.b32.xlu1 %v2978_v19, %s2896_s4  ;;  %266 = vrot.lane.b32.xlu0 %v2990_v23, %s2896_s4 }
  0x31   :  { %164 = vrot.lane.b32.xlu1 %v2981_v20, %s2897_s14  ;;  %270 = vrot.lane.b32.xlu0 %v2988_v22, %s2896_s4 }
  0x35   :  { %168 = vrot.lane.b32.xlu1 %v2978_v19, %s2897_s14  ;;  %166 = vrot.lane.b32.xlu0 %v2990_v23, %s2897_s14 }
  0x39   :  { %294 = vrot.lane.b32.xlu1 %v3007_v27, %s2896_s4  ;;  %170 = vrot.lane.b32.xlu0 %v2988_v22, %s2897_s14 }
  0x3d   :  { %315 = vrot.lane.b32.xlu1 %v2990_v23, %s2898_s15  ;;  %313 = vrot.lane.b32.xlu0 %v2981_v20, %s2898_s15 }
  0x41   :  { %319 = vrot.lane.b32.xlu1 %v2988_v22, %s2898_s15  ;;  %317 = vrot.lane.b32.xlu0 %v2978_v19, %s2898_s15 }
  0x45   :  { %343 = vrot.lane.b32.xlu1 %v3007_v27, %s2898_s15  ;;  %194 = vrot.lane.b32.xlu0 %v3007_v27, %s2897_s14 }
  0x49   :  { %366 = vrot.lane.b32.xlu1 %v2978_v19, %s2899_s16  ;;  %364 = vrot.lane.b32.xlu0 %v2990_v23, %s2899_s16 }
  0x4d   :  { %370 = vrot.lane.b32.xlu1 %v3046_v32, %s2899_s16  ;;  %368 = vrot.lane.b32.xlu0 %v2988_v22, %s2899_s16 }
  0x51   :  { %225 = vrot.lane.b32.xlu1 %v3052_v34, %s2895_s0  ;;  %223 = vrot.lane.b32.xlu0 %v3046_v32, %s2895_s0 }
  0x55   :  { %229 = vrot.lane.b32.xlu1 %v3059_v37, %s2895_s0  ;;  %227 = vrot.lane.b32.xlu0 %v3062_v38, %s2895_s0 }
  0x59   :  { %413 = vrot.lane.b32.xlu1 %v2990_v23, %s2900_s17  ;;  %362 = vrot.lane.b32.xlu0 %v2981_v20, %s2899_s16 }
  0x5d   :  { %417 = vrot.lane.b32.xlu1 %v2988_v22, %s2900_s17  ;;  %415 = vrot.lane.b32.xlu0 %v2978_v19, %s2900_s17 }
  0x61   :  { %272 = vrot.lane.b32.xlu1 %v3046_v32, %s2896_s4  ;;  %419 = vrot.lane.b32.xlu0 %v3046_v32, %s2900_s17 }
  0x65   :  { %276 = vrot.lane.b32.xlu1 %v3062_v38, %s2896_s4  ;;  %274 = vrot.lane.b32.xlu0 %v3052_v34, %s2896_s4 }
  0x69   :  { %411 = vrot.lane.b32.xlu1 %v2981_v20, %s2900_s17  ;;  %278 = vrot.lane.b32.xlu0 %v3059_v37, %s2896_s4 }
  0x6d   :  { %464 = vrot.lane.b32.xlu1 %v2978_v19, %s2901_s18  ;;  %462 = vrot.lane.b32.xlu0 %v2990_v23, %s2901_s18 }
  0x71   :  { %468 = vrot.lane.b32.xlu1 %v3046_v32, %s2901_s18  ;;  %466 = vrot.lane.b32.xlu0 %v2988_v22, %s2901_s18 }
  0x75   :  { %174 = vrot.lane.b32.xlu1 %v3052_v34, %s2897_s14  ;;  %172 = vrot.lane.b32.xlu0 %v3046_v32, %s2897_s14 }
  0x79   :  { %178 = vrot.lane.b32.xlu1 %v3059_v37, %s2897_s14  ;;  %176 = vrot.lane.b32.xlu0 %v3062_v38, %s2897_s14 }
  0x7d   :  { %323 = vrot.lane.b32.xlu1 %v3052_v34, %s2898_s15  ;;  %321 = vrot.lane.b32.xlu0 %v3046_v32, %s2898_s15 }
  0x81   :  { %327 = vrot.lane.b32.xlu1 %v3059_v37, %s2898_s15  ;;  %325 = vrot.lane.b32.xlu0 %v3062_v38, %s2898_s15 }
  0x85   :  { %511 = vrot.lane.b32.xlu1 %v2990_v23, %s2902_s19  ;;  %460 = vrot.lane.b32.xlu0 %v2981_v20, %s2901_s18 }
  0x89   :  { %515 = vrot.lane.b32.xlu1 %v2988_v22, %s2902_s19  ;;  %513 = vrot.lane.b32.xlu0 %v2978_v19, %s2902_s19 }
  0x8d   :  { %372 = vrot.lane.b32.xlu1 %v3052_v34, %s2899_s16  ;;  %517 = vrot.lane.b32.xlu0 %v3046_v32, %s2902_s19 }
  0x91   :  { %376 = vrot.lane.b32.xlu1 %v3059_v37, %s2899_s16  ;;  %374 = vrot.lane.b32.xlu0 %v3062_v38, %s2899_s16 }
  0x93   :  { %v3140_v43 = vpop.permute.xlu1 %219  ;;  %v3142_v44 = vpop.permute.xlu0 %215 }
  0x95   :  { %509 = vrot.lane.b32.xlu1 %v2981_v20, %s2902_s19  ;;  %378 = vrot.lane.b32.xlu0 %v3138_v42, %s2899_s16 }
  0x97   :  { %v3148_v45 = vpop.permute.xlu1 %221  ;;  %v3150_v46 = vpop.permute.xlu0 %217 }
  0x99   :  { %233 = vrot.lane.b32.xlu1 %v2995_v25, %s2895_s0  ;;  %231 = vrot.lane.b32.xlu0 %v3138_v42, %s2895_s0 }
  0x9b   :  { %v3161_v48 = vpop.permute.xlu1 %264  ;;  %v3163_v49 = vpop.permute.xlu0 %245 }
  0x9d   :  { %237 = vrot.lane.b32.xlu1 %v2999_v26, %s2895_s0  ;;  %235 = vrot.lane.b32.xlu0 %v3159_v47, %s2895_s0 }
  0x9f   :  { %v3169_v50 = vpop.permute.xlu1 %268  ;;  %v3171_v51 = vpop.permute.xlu0 %266 }
  0xa1   :  { %423 = vrot.lane.b32.xlu1 %v3062_v38, %s2900_s17  ;;  %421 = vrot.lane.b32.xlu0 %v3052_v34, %s2900_s17 }
  0xa3   :  { %v3177_v52 = vpop.permute.xlu1 %164  ;;  %v3179_v53 = vpop.permute.xlu0 %270 }
  0xa5   :  { %427 = vrot.lane.b32.xlu1 %v3138_v42, %s2900_s17  ;;  %425 = vrot.lane.b32.xlu0 %v3059_v37, %s2900_s17 }
  0xa7   :  { %v3185_v54 = vpop.permute.xlu1 %168  ;;  %v3187_v55 = vpop.permute.xlu0 %166 }
  0xa9   :  { %282 = vrot.lane.b32.xlu1 %v2995_v25, %s2896_s4  ;;  %280 = vrot.lane.b32.xlu0 %v3138_v42, %s2896_s4 }
  0xab   :  { %v3193_v56 = vpop.permute.xlu1 %294  ;;  %v3195_v57 = vpop.permute.xlu0 %170 }
  0xad   :  { %286 = vrot.lane.b32.xlu1 %v2999_v26, %s2896_s4  ;;  %284 = vrot.lane.b32.xlu0 %v3159_v47, %s2896_s4 }
  0xaf   :  { %v3201_v58 = vpop.permute.xlu1 %315  ;;  %v3203_v59 = vpop.permute.xlu0 %313 }
  0xb1   :  { %472 = vrot.lane.b32.xlu1 %v3062_v38, %s2901_s18  ;;  %470 = vrot.lane.b32.xlu0 %v3052_v34, %s2901_s18 }
  0xb3   :  { %v3209_v60 = vpop.permute.xlu1 %319  ;;  %v3211_v61 = vpop.permute.xlu0 %317 }
  0xb5   :  { %476 = vrot.lane.b32.xlu1 %v3138_v42, %s2901_s18  ;;  %474 = vrot.lane.b32.xlu0 %v3059_v37, %s2901_s18 }
  0xb7   :  { %v3217_v62 = vpop.permute.xlu1 %343  ;;  %v3219_v63 = vpop.permute.xlu0 %194 }
  0xb9   :  { %182 = vrot.lane.b32.xlu1 %v2995_v25, %s2897_s14  ;;  %180 = vrot.lane.b32.xlu0 %v3138_v42, %s2897_s14 }
  0xbb   :  { %v3225_v2 = vpop.permute.xlu1 %366  ;;  %v3227_v3 = vpop.permute.xlu0 %364 }
  0xbd   :  { %186 = vrot.lane.b32.xlu1 %v2999_v26, %s2897_s14  ;;  %184 = vrot.lane.b32.xlu0 %v3159_v47, %s2897_s14 }
  0xbf   :  { %v3233_v4 = vpop.permute.xlu1 %370  ;;  %v3235_v5 = vpop.permute.xlu0 %368 }
  0xc1   :  { %331 = vrot.lane.b32.xlu1 %v2995_v25, %s2898_s15  ;;  %329 = vrot.lane.b32.xlu0 %v3138_v42, %s2898_s15 }
  0xc3   :  { %v226_v7 = vpop.permute.xlu1 %225  ;;  %v224_v8 = vpop.permute.xlu0 %223 }
  0xc4   :  { %v259_v6 = vsel %vm247_vm1, %v3148_v45, %v224_v8 }
  0xc5   :  { %335 = vrot.lane.b32.xlu1 %v2999_v26, %s2898_s15  ;;  %333 = vrot.lane.b32.xlu0 %v3159_v47, %s2898_s15 }
  0xc7   :  { %v3247_v9 = vpop.permute.xlu1 %229  ;;  %v228_v11 = vpop.permute.xlu0 %227 }
  0xc9   :  { %521 = vrot.lane.b32.xlu1 %v3062_v38, %s2902_s19  ;;  %519 = vrot.lane.b32.xlu0 %v3052_v34, %s2902_s19  ;;  %v256_v38 = vsel %vm247_vm1, %v228_v11, %v3247_v9 }
  0xcb   :  { %v3253_v12 = vpop.permute.xlu1 %413  ;;  %v3255_v13 = vpop.permute.xlu0 %362 }
  0xcd   :  { %525 = vrot.lane.b32.xlu1 %v3138_v42, %s2902_s19  ;;  %523 = vrot.lane.b32.xlu0 %v3059_v37, %s2902_s19  ;;  %v578_v42 = vrot.slane %v259_v6, 7 }
  0xcf   :  { %v3261_v14 = vpop.permute.xlu1 %417  ;;  %v3263_v15 = vpop.permute.xlu0 %415 }
  0xd1   :  { %382 = vrot.lane.b32.xlu1 %v3159_v47, %s2899_s16  ;;  %380 = vrot.lane.b32.xlu0 %v2995_v25, %s2899_s16 }
  0xd3   :  { %v273_v18 = vpop.permute.xlu1 %272  ;;  %v3274_v21 = vpop.permute.xlu0 %419 }
  0xd4   :  { %v308_v1 = vsel %vm296_vm0, %v3179_v53, %v273_v18 }
  0xd5   :  { %386 = vrot.lane.b32.xlu1 %v3272_v16, %s2899_s16  ;;  %384 = vrot.lane.b32.xlu0 %v2999_v26, %s2899_s16  ;;  %v626_v32 = vrot.slane %v308_v1, 6  ;;  %v3357_v1 = vsel %vm247_vm1, %v3140_v43, %v3148_v45  ;;  %v581_v45 = vrot.slane %v256_v38, 7  ;;  %v3385_v38 = vsel %vm247_vm1, %v3163_v49, %v3142_v44 }
  0xd7   :  { %v277_v29 = vpop.permute.xlu1 %276  ;;  %v275_v30 = vpop.permute.xlu0 %274 }
  0xd8   :  { %v3286_v31 = vsel %vm296_vm0, %v275_v30, %v277_v29  ;;  %v307_v33 = vsel %vm296_vm0, %v273_v18, %v275_v30 }
  0xd9   :  { %241 = vrot.lane.b32.xlu1 %v3073_v41, %s2895_s0  ;;  %239 = vrot.lane.b32.xlu0 %v3272_v16, %s2895_s0  ;;  %v627_v23 = vrot.slane %v307_v33, 6 }
  0xdb   :  { %v3299_v35 = vpop.permute.xlu1 %411  ;;  %v3301_v36 = vpop.permute.xlu0 %278 }
  0xdc   :  { %v305_v39 = vsel %vm296_vm0, %v277_v29, %v3301_v36  ;;  %v258_v29 = vsel %vm247_vm1, %v224_v8, %v226_v7  ;;  %v257_v8 = vsel %vm247_vm1, %v226_v7, %v228_v11 }
  0xdd   :  { %429 = vrot.lane.b32.xlu1 %v2995_v25, %s2900_s17  ;;  %243 = vrot.lane.b32.xlu0 %v3297_v0, %s2895_s0  ;;  %v579_v37 = vrot.slane %v258_v29, 7 }
  0xdf   :  { %v3310_v40 = vpop.permute.xlu1 %464  ;;  %v3312_v30 = vpop.permute.xlu0 %462 }
  0xe1   :  { %433 = vrot.lane.b32.xlu1 %v2999_v26, %s2900_s17  ;;  %431 = vrot.lane.b32.xlu0 %v3159_v47, %s2900_s17 }
  0xe3   :  { %v3319_v17 = vpop.permute.xlu1 %468  ;;  %v3321_v24 = vpop.permute.xlu0 %466 }
  0xe5   :  { %288 = vrot.lane.b32.xlu1 %v3272_v16, %s2896_s4  ;;  %435 = vrot.lane.b32.xlu0 %v3272_v16, %s2900_s17 }
  0xe7   :  { %v175_v34 = vpop.permute.xlu1 %174  ;;  %v173_v18 = vpop.permute.xlu0 %172 }
  0xe8   :  { %v209_v20 = vsel %vm198_vm2, %v173_v18, %v175_v34  ;;  %v210_v22 = vsel %vm198_vm2, %v3195_v57, %v173_v18 }
  0xe9   :  { %v899_v6 = vsel %vm894_vm3, %v210_v22, %v578_v42  ;;  %v900_v29 = vsel %vm894_vm3, %v209_v20, %v579_v37  ;;  %292 = vrot.lane.b32.xlu1 %v3297_v0, %s2896_s4  ;;  %290 = vrot.lane.b32.xlu0 %v3073_v41, %s2896_s4  ;;  %v261_v20 = vsel %vm247_vm1, %v3150_v46, %v3140_v43  ;;  %v580_v42 = vrot.slane %v257_v8, 7 }
  0xea   :  { %v916_v7 = vsel %vm911_vm4, %v899_v6, %v626_v32  ;;  %v917_v22 = vsel %vm911_vm4, %v900_v29, %v627_v23  ;;  %v262_v37 = vsel %vm247_vm1, %v3142_v44, %v3150_v46  ;;  %v628_v32 = vrot.slane %v3286_v31, 6 }
  0xeb   :  { %v3371_v11 = vpop.permute.xlu1 %178  ;;  %v177_v33 = vpop.permute.xlu0 %176  ;;  %v629_v23 = vrot.slane %v305_v39, 6  ;;  %v577_v46 = vrot.slane %v3357_v1, 7  ;;  %v575_v8 = vrot.slane %v262_v37, 7  ;;  %v576_v29 = vrot.slane %v261_v20, 7 }
  0xec   :  { %v207_v43 = vsel %vm198_vm2, %v177_v33, %v3371_v11  ;;  %v208_v18 = vsel %vm198_vm2, %v175_v34, %v177_v33  ;;  %v311_v34 = vsel %vm296_vm0, %v3161_v48, %v3171_v51  ;;  %v310_v1 = vsel %vm296_vm0, %v3171_v51, %v3169_v50 }
  0xed   :  { %v901_v31 = vsel %vm894_vm3, %v208_v18, %v580_v42  ;;  %v902_v39 = vsel %vm894_vm3, %v207_v43, %v581_v45  ;;  %480 = vrot.lane.b32.xlu1 %v3159_v47, %s2901_s18  ;;  %478 = vrot.lane.b32.xlu0 %v2995_v25, %s2901_s18  ;;  %v309_v37 = vsel %vm296_vm0, %v3169_v50, %v3179_v53  ;;  %v623_v53 = vrot.slane %v311_v34, 6 }
  0xee   :  { %v918_v6 = vsel %vm911_vm4, %v901_v31, %v628_v32  ;;  %v919_v44 = vsel %vm911_vm4, %v902_v39, %v629_v23  ;;  %v213_v42 = vsel %vm198_vm2, %v3177_v52, %v3187_v55  ;;  %v574_v32 = vrot.slane %v3385_v38, 7 }
  0xef   :  { %v324_v45 = vpop.permute.xlu1 %323  ;;  %v322_v33 = vpop.permute.xlu0 %321  ;;  %v212_v20 = vsel %vm198_vm2, %v3187_v55, %v3185_v54  ;;  %v360_v23 = vsel %vm345_vm5, %v3203_v59, %v3201_v58  ;;  %v624_v55 = vrot.slane %v310_v1, 6  ;;  %v625_v31 = vrot.slane %v309_v37, 6 }
  0xf0   :  { %v356_v51 = vsel %vm345_vm5, %v322_v33, %v324_v45  ;;  %v357_v50 = vsel %vm345_vm5, %v3209_v60, %v322_v33  ;;  %v896_v39 = vsel %vm894_vm3, %v213_v42, %v575_v8  ;;  %v211_v34 = vsel %vm198_vm2, %v3185_v54, %v3195_v57 }
  0xf1   :  { %v674_v43 = vrot.slane %v357_v50, 5  ;;  %v675_v18 = vrot.slane %v356_v51, 5  ;;  %484 = vrot.lane.b32.xlu1 %v3272_v16, %s2901_s18  ;;  %482 = vrot.lane.b32.xlu0 %v2999_v26, %s2901_s18  ;;  %v897_v33 = vsel %vm894_vm3, %v212_v20, %v576_v29  ;;  %v359_v51 = vsel %vm345_vm5, %v3201_v58, %v3211_v61 }
  0xf2   :  { %v671_v42 = vrot.slane %v360_v23, 5  ;;  %v408_v54 = vsel %vm394_vm7, %v3227_v3, %v3225_v2  ;;  %v914_v23 = vsel %vm911_vm4, %v897_v33, %v624_v55  ;;  %v409_v38 = vsel %vm394_vm7, %v3255_v13, %v3227_v3 }
  0xf3   :  { %v3441_v50 = vsel %vm928_vm6, %v916_v7, %v674_v43  ;;  %v3444_v1 = vsel %vm928_vm6, %v917_v22, %v675_v18  ;;  %v3446_v8 = vpop.permute.xlu1 %327  ;;  %v326_v37 = vpop.permute.xlu0 %325  ;;  %v913_v7 = vsel %vm911_vm4, %v896_v39, %v623_v53  ;;  %v898_v22 = vsel %vm894_vm3, %v211_v34, %v577_v46 }
  0xf4   :  { %v354_v57 = vsel %vm345_vm5, %v326_v37, %v3446_v8  ;;  %v355_v58 = vsel %vm345_vm5, %v324_v45, %v326_v37  ;;  %v358_v45 = vsel %vm345_vm5, %v3211_v61, %v3209_v60  ;;  %v672_v43 = vrot.slane %v359_v51, 5 }
  0xf5   :  { %v676_v29 = vrot.slane %v355_v58, 5  ;;  %v677_v20 = vrot.slane %v354_v57, 5  ;;  %190 = vrot.lane.b32.xlu1 %v3073_v41, %s2897_s14  ;;  %188 = vrot.lane.b32.xlu0 %v3272_v16, %s2897_s14  ;;  %v457_v46 = vsel %vm443_vm8, %v3253_v12, %v3263_v15  ;;  %v719_v53 = vrot.slane %v408_v54, 4 }
  0xf6   :  { %v506_v18 = vsel %vm492_vm9, %v3312_v30, %v3310_v40  ;;  %v3490_v61 = vsel %vm296_vm0, %v3193_v56, %v3161_v48  ;;  %v915_v33 = vsel %vm911_vm4, %v898_v22, %v625_v31  ;;  %v930_v51 = vsel %vm928_vm6, %v913_v7, %v671_v42 }
  0xf7   :  { %v3477_v39 = vsel %vm928_vm6, %v918_v6, %v676_v29  ;;  %v3480_v55 = vsel %vm928_vm6, %v919_v44, %v677_v20  ;;  %v3482_v34 = vpop.permute.xlu1 %511  ;;  %v3484_v60 = vpop.permute.xlu0 %460  ;;  %v407_v6 = vsel %vm394_vm7, %v3225_v2, %v3235_v5  ;;  %v673_v44 = vrot.slane %v358_v45, 5 }
  0xf8   :  { %v406_v37 = vsel %vm394_vm7, %v3235_v5, %v3233_v4  ;;  %v456_v48 = vsel %vm443_vm8, %v3263_v15, %v3261_v14  ;;  %v767_v54 = vrot.slane %v457_v46, 3  ;;  %v931_v2 = vsel %vm928_vm6, %v914_v23, %v672_v43  ;;  %v1014_v46 = vld [vmem:[#allocation2 + $0x8] sm:$0xff] }
  0xf9   :  { %337 = vrot.lane.b32.xlu1 %v3272_v16, %s2898_s15  ;;  %192 = vrot.lane.b32.xlu0 %v3297_v0, %s2897_s14  ;;  %v455_v31 = vsel %vm443_vm8, %v3261_v14, %v3274_v21  ;;  %v815_v5 = vrot.slane %v506_v18, 2  ;;  %v505_v15 = vsel %vm492_vm9, %v3310_v40, %v3321_v24  ;;  %v214_v42 = vsel %vm198_vm2, %v3219_v63, %v3177_v52 }
  0xfa   :  { %v720_v57 = vrot.slane %v407_v6, 4  ;;  %v504_v58 = vsel %vm492_vm9, %v3321_v24, %v3319_v17  ;;  %v947_v14 = vsel %vm945_vm10, %v930_v51, %v719_v53  ;;  %v721_v29 = vrot.slane %v406_v37, 4 }
  0xfb   :  { %v516_v7 = vpop.permute.xlu1 %515  ;;  %v514_v22 = vpop.permute.xlu0 %513  ;;  %v768_v20 = vrot.slane %v456_v48, 3  ;;  %v769_v52 = vrot.slane %v455_v31, 3  ;;  %v816_v45 = vrot.slane %v505_v15, 2  ;;  %v964_v24 = vsel %vm962_vm12, %v947_v14, %v767_v54 }
  0xfc   :  { %v554_v40 = vsel %vm541_vm11, %v514_v22, %v516_v7  ;;  %v555_v23 = vsel %vm541_vm11, %v3482_v34, %v514_v22  ;;  %v932_v53 = vsel %vm928_vm6, %v915_v33, %v673_v44  ;;  %v817_v18 = vrot.slane %v504_v58, 2 }
  0xfd   :  { %v863_v43 = vrot.slane %v555_v23, 1  ;;  %341 = vrot.lane.b32.xlu1 %v3297_v0, %s2898_s15  ;;  %339 = vrot.lane.b32.xlu0 %v3073_v41, %s2898_s15  ;;  %v864_v51 = vrot.slane %v554_v40, 1  ;;  %v981_v6 = vsel %vm979_vm13, %v964_v24, %v815_v5  ;;  %v361_v37 = vsel %vm345_vm5, %v3217_v62, %v3203_v59 }
  0xfe   :  { %v895_v48 = vsel %vm894_vm3, %v214_v42, %v574_v32  ;;  %v948_v31 = vsel %vm945_vm10, %v931_v2, %v720_v57  ;;  %v949_v58 = vsel %vm945_vm10, %v932_v53, %v721_v29  ;;  %v1016_v42 = vld [vmem:[#allocation2 + $0x18] sm:$0xff]  ;;  %v458_v22 = vsel %vm443_vm8, %v3299_v35, %v3253_v12  ;;  %v1015_v29 = vld [vmem:[#allocation2 + $0x10] sm:$0xff] }
  0xff   :  { %v3548_v15 = vpop.permute.xlu1 %372  ;;  %v3550_v54 = vpop.permute.xlu0 %517  ;;  %v998_v33 = vsel %vm996_vm14, %v981_v6, %v863_v43  ;;  %v965_v59 = vsel %vm962_vm12, %v948_v31, %v768_v20  ;;  %v966_v2 = vsel %vm962_vm12, %v949_v58, %v769_v52  ;;  %v670_v20 = vrot.slane %v361_v37, 5  ;;  %v3597_v6 = vld [vmem:[%s4296_s2] sm:$0xff] }
 0x100   :  { %v553_v44 = vsel %vm541_vm11, %v516_v7, %v3550_v54  ;;  %v1030_v5 = vmul.f32 %v1014_v46, %v998_v33  ;;  %v982_v57 = vsel %vm979_vm13, %v965_v59, %v816_v45  ;;  %v622_v7 = vrot.slane %v3490_v61, 6 }
 0x101   :  { %v865_v32 = vrot.slane %v553_v44, 1  ;;  %529 = vrot.lane.b32.xlu1 %v3159_v47, %s2902_s19  ;;  %527 = vrot.lane.b32.xlu0 %v2995_v25, %s2902_s19  ;;  %v983_v3 = vsel %vm979_vm13, %v966_v2, %v817_v18  ;;  %v999_v14 = vsel %vm996_vm14, %v982_v57, %v864_v51  ;;  %v507_v40 = vsel %vm492_vm9, %v3484_v60, %v3312_v30  ;;  %v1013_v44 = vld [vmem:[#allocation2] sm:$0xff] }
 0x102   :  { %1166 = vmatprep.subr.mxu0 %v1030_v5  ;;  %v912_v12 = vsel %vm911_vm4, %v895_v48, %v622_v7  ;;  %v718_v45 = vrot.slane %v409_v38, 4  ;;  %v766_v24 = vrot.slane %v458_v22, 3  ;;  %v1031_v46 = vmul.f32 %v1015_v29, %v999_v14 }
 0x103   :  { %v3579_v23 = vpop.permute.xlu1 %376  ;;  %v3581_v61 = vpop.permute.xlu0 %374  ;;  %v1000_v52 = vsel %vm996_vm14, %v983_v3, %v865_v32  ;;  %v814_v53 = vrot.slane %v507_v40, 2  ;;  %v929_v30 = vsel %vm928_vm6, %v912_v12, %v670_v20  ;;  %v4327_v58 = vmov 0.0  }
 0x104   :  { %v1032_v43 = vmul.f32 %v1016_v42, %v1000_v52  ;;  %v946_v37 = vsel %vm945_vm10, %v929_v30, %v718_v45  ;;  %v405_v42 = vsel %vm394_vm7, %v3233_v4, %v3548_v15  ;;  %v1046_v30 = vld [vmem:[%s4297_s3] sm:$0xff] }
 0x105   :  { %533 = vrot.lane.b32.xlu1 %v3272_v16, %s2902_s19  ;;  %531 = vrot.lane.b32.xlu0 %v2999_v26, %s2902_s19  ;;  %v963_v31 = vsel %vm962_vm12, %v946_v37, %v766_v24  ;;  %v722_v4 = vrot.slane %v405_v42, 4 }
 0x106   :  { %1237 = vmatprep.subr.mxu1 %v1032_v43  ;;  %v980_v5 = vsel %vm979_vm13, %v963_v31, %v814_v53 }
 0x107   :  { %v3590_v18 = vpop.permute.xlu1 %509  ;;  %1238 = vmatpush1.msra.mxu1 %v1031_v46  ;;  %v3592_v51 = vpop.permute.xlu0 %378  ;;  %v950_v52 = vsel %vm945_vm10, %v3441_v50, %v722_v4 }
 0x108   :  { %v556_v48 = vsel %vm541_vm11, %v3590_v18, %v3482_v34  ;;  %2779 = vmatmul.mubr.msk.f32.vlgmr.msra.gmra.mxu1 %vm1132_vm15, %v3597_v6 }
 0x109   :  { %v862_v33 = vrot.slane %v556_v48, 1  ;;  %390 = vrot.lane.b32.xlu1 %v3297_v0, %s2899_s16  ;;  %388 = vrot.lane.b32.xlu0 %v3073_v41, %s2899_s16 }
 0x10a   :  { %1413 = vmatprep.mubr.f32.mxu1 %v4327_v58 }
 0x10b   :  { %v234_v59 = vpop.permute.xlu1 %233  ;;  %v232_v38 = vpop.permute.xlu0 %231  ;;  %v997_v34 = vsel %vm996_vm14, %v980_v5, %v862_v33 }
 0x10c   :  { %v254_v32 = vsel %vm247_vm1, %v232_v38, %v234_v59  ;;  %v1029_v2 = vmul.f32 %v1013_v44, %v997_v34 }
 0x10d   :  { %437 = vrot.lane.b32.xlu1 %v3073_v41, %s2900_s17  ;;  %392 = vrot.lane.b32.xlu0 %v3007_v27, %s2899_s16 }
 0x10e   :  { %1167 = vmatpush1.msra.mxu0 %v1029_v2 }
 0x10f   :  { %v3624_v57 = vpop.permute.xlu1 %237  ;;  %v236_v7 = vpop.permute.xlu0 %235  ;;  %2778 = vmatmul.mubr.msk.f32.vlgmr.msra.gmra.mxu0 %vm1132_vm15, %v3597_v6 }
 0x110   :  { %v3631_v22 = vsel %vm247_vm1, %v236_v7, %v3624_v57  ;;  %v253_v3 = vsel %vm247_vm1, %v234_v59, %v236_v7  ;;  %1342 = vmatprep.mubr.f32.mxu0 %v4327_v58  ;;  %v255_v7 = vsel %vm247_vm1, %v3247_v9, %v232_v38 }
 0x111   :  { %441 = vrot.lane.b32.xlu1 %v3007_v27, %s2900_s17  ;;  %439 = vrot.lane.b32.xlu0 %v3297_v0, %s2900_s17  ;;  %v582_v4 = vrot.slane %v255_v7, 7  ;;  %v584_v38 = vrot.slane %v253_v3, 7 }
 0x113   :  { %v3640_v14 = vpop.permute.xlu1 %423  ;;  %v3642_v29 = vpop.permute.xlu0 %421 }
 0x114   :  { %v454_v20 = vsel %vm443_vm8, %v3274_v21, %v3642_v29  ;;  %v2904_v21 = vmov 0  }
 0x115   :  { %v770_v40 = vrot.slane %v454_v20, 3  ;;  %488 = vrot.lane.b32.xlu1 %v3297_v0, %s2901_s18  ;;  %486 = vrot.lane.b32.xlu0 %v3073_v41, %s2901_s18  ;;  %v583_v20 = vrot.slane %v254_v32, 7  ;;  %v585_v32 = vrot.slane %v3631_v22, 7 }
 0x116   :  { %2847 = vset.pattern.permute.xlu0 %v2904_v21  ;;  %2848 = vset.pattern.permute.xlu1 %v2904_v21 }
 0x117   :  { %v967_v12 = vsel %vm962_vm12, %v950_v52, %v770_v40  ;;  %v3655_v45 = vpop.permute.xlu1 %427  ;;  %v3657_v43 = vpop.permute.xlu0 %425 }
 0x119   :  { %535 = vrot.lane.b32.xlu1 %v3073_v41, %s2902_s19  ;;  %490 = vrot.lane.b32.xlu0 %v3007_v27, %s2901_s18 }
 0x11b   :  { %v283_v24 = vpop.permute.xlu1 %282  ;;  %v281_v46 = vpop.permute.xlu0 %280 }
 0x11c   :  { %v303_v50 = vsel %vm296_vm0, %v281_v46, %v283_v24  ;;  %v304_v53 = vsel %vm296_vm0, %v3301_v36, %v281_v46 }
 0x11d   :  { %539 = vrot.lane.b32.xlu1 %v3007_v27, %s2902_s19  ;;  %537 = vrot.lane.b32.xlu0 %v3297_v0, %s2902_s19  ;;  %v630_v21 = vrot.slane %v304_v53, 6  ;;  %v1021_v27 = vld [vmem:[#allocation2 + $0x40] sm:$0xff] }
 0x11f   :  { %v3675_v37 = vpop.permute.xlu1 %286  ;;  %v285_v48 = vpop.permute.xlu0 %284 }
 0x120   :  { %v301_v31 = vsel %vm296_vm0, %v285_v48, %v3675_v37  ;;  %v302_v36 = vsel %vm296_vm0, %v283_v24, %v285_v48  ;;  %v631_v24 = vrot.slane %v303_v50, 6 }
 0x121   :  { %1049 = vperm.xlu0 %2847, %v1046_v30  }
 0x123   :  { %v473_v33 = vpop.permute.xlu1 %472  ;;  %v471_v44 = vpop.permute.xlu0 %470 }
 0x124   :  { %v503_v5 = vsel %vm492_vm9, %v3319_v17, %v471_v44 }
 0x125   :  { %v818_v59 = vrot.slane %v503_v5, 2  ;;  %v632_v5 = vrot.slane %v302_v36, 6 }
 0x127   :  { %v3686_v34 = vsel %vm979_vm13, %v967_v12, %v818_v59  ;;  %v3688_v2 = vpop.permute.xlu1 %476  ;;  %v475_v42 = vpop.permute.xlu0 %474  ;;  %v633_v59 = vrot.slane %v301_v31, 6  ;;  %v404_v31 = vsel %vm394_vm7, %v3548_v15, %v3581_v61  ;;  %v403_v15 = vsel %vm394_vm7, %v3581_v61, %v3579_v23 }
 0x12b   :  { %v183_v40 = vpop.permute.xlu1 %182  ;;  %v181_v52 = vpop.permute.xlu0 %180 }
 0x12c   :  { %v205_v17 = vsel %vm198_vm2, %v181_v52, %v183_v40  ;;  %v206_v12 = vsel %vm198_vm2, %v3371_v11, %v181_v52 }
 0x12d   :  { %v903_v46 = vsel %vm894_vm3, %v206_v12, %v582_v4  ;;  %v904_v30 = vsel %vm894_vm3, %v205_v17, %v583_v20  ;;  %v723_v17 = vrot.slane %v404_v31, 4  ;;  %v502_v12 = vsel %vm492_vm9, %v471_v44, %v473_v33 }
 0x12e   :  { %v920_v48 = vsel %vm911_vm4, %v903_v46, %v630_v21  ;;  %v3702_v9 = vsel %vm911_vm4, %v904_v30, %v631_v24  ;;  %v453_v21 = vsel %vm443_vm8, %v3642_v29, %v3640_v14  ;;  %v402_v29 = vsel %vm394_vm7, %v3579_v23, %v3592_v51 }
 0x12f   :  { %v3705_v50 = vpop.permute.xlu1 %186  ;;  %v185_v53 = vpop.permute.xlu0 %184  ;;  %v951_v44 = vsel %vm945_vm10, %v3444_v1, %v723_v17  ;;  %v452_v23 = vsel %vm443_vm8, %v3640_v14, %v3657_v43  ;;  %v1018_v17 = vld [vmem:[#allocation2 + $0x28] sm:$0xff] }
 0x130   :  { %v203_v11 = vsel %vm198_vm2, %v185_v53, %v3705_v50  ;;  %v204_v7 = vsel %vm198_vm2, %v183_v40, %v185_v53 }
 0x131   :  { %v905_v4 = vsel %vm894_vm3, %v204_v7, %v584_v38  ;;  %v906_v20 = vsel %vm894_vm3, %v203_v11, %v585_v32  ;;  %v771_v38 = vrot.slane %v453_v21, 3  ;;  %v724_v32 = vrot.slane %v403_v15, 4 }
 0x132   :  { %v922_v3 = vsel %vm911_vm4, %v905_v4, %v632_v5  ;;  %v3716_v22 = vsel %vm911_vm4, %v906_v20, %v633_v59  ;;  %v819_v5 = vrot.slane %v502_v12, 2  ;;  %v725_v59 = vrot.slane %v402_v29, 4 }
 0x133   :  { %v3722_v36 = vpop.permute.xlu1 %331  ;;  %v3724_v52 = vpop.permute.xlu0 %329  ;;  %v500_v11 = vsel %vm492_vm9, %v475_v42, %v3688_v2  ;;  %v501_v7 = vsel %vm492_vm9, %v473_v33, %v475_v42  ;;  %v968_v31 = vsel %vm962_vm12, %v951_v44, %v771_v38  ;;  %v1017_v33 = vld [vmem:[#allocation2 + $0x20] sm:$0xff]  ;;  %v952_v29 = vsel %vm945_vm10, %v3477_v39, %v724_v32 }
 0x134   :  { %v353_v40 = vsel %vm345_vm5, %v3446_v8, %v3724_v52  ;;  %v985_v42 = vsel %vm979_vm13, %v968_v31, %v819_v5  ;;  %v821_v12 = vrot.slane %v500_v11, 2  ;;  %v953_v38 = vsel %vm945_vm10, %v3480_v55, %v725_v59  ;;  %v1020_v11 = vld [vmem:[#allocation2 + $0x38] sm:$0xff] }
 0x135   :  { %v678_v24 = vrot.slane %v353_v40, 5 }
 0x137   :  { %v937_v46 = vsel %vm928_vm6, %v920_v48, %v678_v24  ;;  %v3741_v30 = vpop.permute.xlu1 %335  ;;  %v3743_v8 = vpop.permute.xlu0 %333  ;;  %v451_v48 = vsel %vm443_vm8, %v3657_v43, %v3655_v45  ;;  %v772_v43 = vrot.slane %v452_v23, 3 }
 0x138   :  { %v351_v61 = vsel %vm345_vm5, %v3722_v36, %v3743_v8  ;;  %v773_v21 = vrot.slane %v451_v48, 3 }
 0x139   :  { %v680_v53 = vrot.slane %v351_v61, 5  ;;  %v969_v32 = vsel %vm962_vm12, %v952_v29, %v772_v43 }
 0x13a   :  { %v970_v55 = vsel %vm962_vm12, %v953_v38, %v773_v21 }
 0x13b   :  { %v3769_v1 = vsel %vm928_vm6, %v922_v3, %v680_v53  ;;  %v522_v4 = vpop.permute.xlu1 %521  ;;  %v520_v20 = vpop.permute.xlu0 %519  ;;  %v820_v3 = vrot.slane %v501_v7, 2  ;;  %v1019_v7 = vld [vmem:[#allocation2 + $0x30] sm:$0xff]  ;;  %v987_v31 = vsel %vm979_vm13, %v970_v55, %v821_v12 }
 0x13c   :  { %v551_v40 = vsel %vm541_vm11, %v520_v20, %v522_v4  ;;  %v552_v14 = vsel %vm541_vm11, %v3550_v54, %v520_v20 }
 0x13d   :  { %v866_v24 = vrot.slane %v552_v14, 1  ;;  %v867_v15 = vrot.slane %v551_v40, 1  ;;  %v986_v20 = vsel %vm979_vm13, %v969_v32, %v820_v3 }
 0x13f   :  { %v1001_v61 = vsel %vm996_vm14, %v3686_v34, %v866_v24  ;;  %v3784_v54 = vpop.permute.xlu1 %525  ;;  %v524_v53 = vpop.permute.xlu0 %523  ;;  %v1002_v44 = vsel %vm996_vm14, %v985_v42, %v867_v15 }
 0x140   :  { %v549_v48 = vsel %vm541_vm11, %v524_v53, %v3784_v54  ;;  %v550_v23 = vsel %vm541_vm11, %v522_v4, %v524_v53  ;;  %v1034_v5 = vmul.f32 %v1018_v17, %v1002_v44  ;;  %v1033_v39 = vmul.f32 %v1017_v33, %v1001_v61 }
 0x141   :  { %v868_v59 = vrot.slane %v550_v23, 1  ;;  %v869_v34 = vrot.slane %v549_v48, 1 }
 0x142   :  { %1308 = vmatprep.subr.mxu0 %v1034_v5 }
 0x143   :  { %v1003_v40 = vsel %vm996_vm14, %v986_v20, %v868_v59  ;;  %v383_v14 = vpop.permute.xlu1 %382  ;;  %1309 = vmatpush1.msra.mxu0 %v1033_v39  ;;  %v381_v4 = vpop.permute.xlu0 %380  ;;  %v1004_v24 = vsel %vm996_vm14, %v987_v31, %v869_v34 }
 0x144   :  { %v401_v43 = vsel %vm394_vm7, %v3592_v51, %v381_v4  ;;  %v1036_v21 = vmul.f32 %v1020_v11, %v1004_v24  ;;  %v1035_v15 = vmul.f32 %v1019_v7, %v1003_v40  ;;  %2780 = vmatmul.mubr.msk.f32.vlgmr.msra.gmra.mxu0 %vm1132_vm15, %v3597_v6 }
 0x145   :  { %v726_v17 = vrot.slane %v401_v43, 4  ;;  %1484 = vmatprep.mubr.f32.mxu0 %v4327_v58 }
 0x146   :  { %1379 = vmatprep.subr.mxu1 %v1036_v21 }
 0x147   :  { %v954_v33 = vsel %vm945_vm10, %v937_v46, %v726_v17  ;;  %v3805_v42 = vpop.permute.xlu1 %386  ;;  %1380 = vmatpush1.msra.mxu1 %v1035_v15  ;;  %v385_v3 = vpop.permute.xlu0 %384 }
 0x148   :  { %2781 = vmatmul.mubr.msk.f32.vlgmr.msra.gmra.mxu1 %vm1132_vm15, %v3597_v6 }
 0x149   :  { %1555 = vmatprep.mubr.f32.mxu1 %v4327_v58 }
 0x14b   :  { %v3810_v51 = vpop.permute.xlu1 %241  ;;  %v3812_v12 = vpop.permute.xlu0 %239 }
 0x14c   :  { %v251_v31 = vsel %vm247_vm1, %v3624_v57, %v3812_v12 }
 0x14d   :  { %v586_v24 = vrot.slane %v251_v31, 7 }
 0x14f   :  { %v430_v29 = vpop.permute.xlu1 %429  ;;  %v3814_v38 = vpop.permute.xlu0 %243 }
 0x150   :  { %v450_v46 = vsel %vm443_vm8, %v3655_v45, %v430_v29 }
 0x151   :  { %v774_v61 = vrot.slane %v450_v46, 3 }
 0x153   :  { %v971_v53 = vsel %vm962_vm12, %v954_v33, %v774_v61  ;;  %v434_v44 = vpop.permute.xlu1 %433  ;;  %v432_v48 = vpop.permute.xlu0 %431 }
 0x157   :  { %v3820_v23 = vpop.permute.xlu1 %288  ;;  %v3822_v5 = vpop.permute.xlu0 %435 }
 0x158   :  { %v300_v40 = vsel %vm296_vm0, %v3675_v37, %v3820_v23  ;;  %v352_v37 = vsel %vm345_vm5, %v3724_v52, %v3722_v36  ;;  %v350_v36 = vsel %vm345_vm5, %v3743_v8, %v3741_v30 }
 0x159   :  { %v634_v21 = vrot.slane %v300_v40, 6 }
 0x15b   :  { %v3824_v39 = vpop.permute.xlu1 %292  ;;  %v3826_v32 = vpop.permute.xlu0 %290 }
 0x15f   :  { %v481_v55 = vpop.permute.xlu1 %480  ;;  %v479_v59 = vpop.permute.xlu0 %478 }
 0x160   :  { %v499_v34 = vsel %vm492_vm9, %v3688_v2, %v479_v59  ;;  %v498_v52 = vsel %vm492_vm9, %v479_v59, %v481_v55 }
 0x161   :  { %v822_v45 = vrot.slane %v499_v34, 2  ;;  %v679_v34 = vrot.slane %v352_v37, 5 }
 0x163   :  { %v988_v11 = vsel %vm979_vm13, %v971_v53, %v822_v45  ;;  %v3832_v7 = vpop.permute.xlu1 %484  ;;  %v483_v20 = vpop.permute.xlu0 %482  ;;  %v449_v45 = vsel %vm443_vm8, %v430_v29, %v432_v48  ;;  %v398_v29 = vsel %vm394_vm7, %v385_v3, %v3805_v42  ;;  %v938_v59 = vsel %vm928_vm6, %v3702_v9, %v679_v34 }
 0x164   :  { %v775_v8 = vrot.slane %v449_v45, 3 }
 0x167   :  { %v3842_v43 = vpop.permute.xlu1 %190  ;;  %v3844_v2 = vpop.permute.xlu0 %188 }
 0x168   :  { %v202_v15 = vsel %vm198_vm2, %v3705_v50, %v3844_v2  ;;  %v400_v50 = vsel %vm394_vm7, %v381_v4, %v383_v14 }
 0x169   :  { %v907_v17 = vsel %vm894_vm3, %v202_v15, %v586_v24  ;;  %v727_v4 = vrot.slane %v400_v50, 4  ;;  %v681_v15 = vrot.slane %v350_v36, 5  ;;  %v496_v50 = vsel %vm492_vm9, %v483_v20, %v3832_v7 }
 0x16a   :  { %v924_v57 = vsel %vm911_vm4, %v907_v17, %v634_v21  ;;  %v399_v21 = vsel %vm394_vm7, %v383_v14, %v385_v3  ;;  %v447_v17 = vsel %vm443_vm8, %v434_v44, %v3822_v5  ;;  %v497_v14 = vsel %vm492_vm9, %v481_v55, %v483_v20 }
 0x16b   :  { %v3856_v33 = vpop.permute.xlu1 %337  ;;  %v3858_v46 = vpop.permute.xlu0 %192  ;;  %v728_v37 = vrot.slane %v399_v21, 4  ;;  %v777_v36 = vrot.slane %v447_v17, 3  ;;  %v1022_v21 = vld [vmem:[#allocation2 + $0x48] sm:$0xff]  ;;  %v940_v55 = vsel %vm928_vm6, %v3716_v22, %v681_v15 }
 0x16c   :  { %v349_v61 = vsel %vm345_vm5, %v3741_v30, %v3856_v33  ;;  %v448_v30 = vsel %vm443_vm8, %v432_v48, %v434_v44 }
 0x16d   :  { %v682_v53 = vrot.slane %v349_v61, 5  ;;  %v729_v61 = vrot.slane %v398_v29, 4  ;;  %v776_v9 = vrot.slane %v448_v30, 3  ;;  %v825_v30 = vrot.slane %v496_v50, 2 }
 0x16f   :  { %v3875_v31 = vsel %vm928_vm6, %v924_v57, %v682_v53  ;;  %v3877_v40 = vpop.permute.xlu1 %341  ;;  %v3879_v24 = vpop.permute.xlu0 %339  ;;  %v823_v57 = vrot.slane %v498_v52, 2  ;;  %v955_v53 = vsel %vm945_vm10, %v938_v59, %v727_v4  ;;  %v824_v4 = vrot.slane %v497_v14, 2  ;;  %v1024_v14 = vld [vmem:[#allocation2 + $0x58] sm:$0xff] }
 0x170   :  { %v972_v45 = vsel %vm962_vm12, %v955_v53, %v775_v8  ;;  %v956_v59 = vsel %vm945_vm10, %v3769_v1, %v728_v37  ;;  %v957_v41 = vsel %vm945_vm10, %v940_v55, %v729_v61  ;;  %v1023_v53 = vld [vmem:[#allocation2 + $0x50] sm:$0xff]  ;;  %v249_v55 = vsel %vm247_vm1, %v3810_v51, %v3814_v38 }
 0x171   :  { %v989_v20 = vsel %vm979_vm13, %v972_v45, %v823_v57  ;;  %v973_v1 = vsel %vm962_vm12, %v956_v59, %v776_v9  ;;  %v974_v37 = vsel %vm962_vm12, %v957_v41, %v777_v36  ;;  %v200_v59 = vsel %vm198_vm2, %v3842_v43, %v3858_v46 }
 0x173   :  { %v530_v3 = vpop.permute.xlu1 %529  ;;  %v528_v48 = vpop.permute.xlu0 %527 }
 0x174   :  { %v547_v34 = vsel %vm541_vm11, %v528_v48, %v530_v3  ;;  %v548_v44 = vsel %vm541_vm11, %v3784_v54, %v528_v48 }
 0x175   :  { %v870_v52 = vrot.slane %v548_v44, 1  ;;  %v871_v29 = vrot.slane %v547_v34, 1  ;;  %v990_v34 = vsel %vm979_vm13, %v973_v1, %v824_v4  ;;  %v991_v44 = vsel %vm979_vm13, %v974_v37, %v825_v30 }
 0x176   :  { %v248_v30 = vsel %vm247_vm1, %v3814_v38, %v3163_v49  ;;  %v588_v49 = vrot.slane %v249_v55, 7  ;;  %v298_v38 = vsel %vm296_vm0, %v3826_v32, %v3824_v39 }
 0x177   :  { %v1005_v54 = vsel %vm996_vm14, %v988_v11, %v870_v52  ;;  %v3912_v8 = vpop.permute.xlu1 %533  ;;  %v532_v17 = vpop.permute.xlu0 %531  ;;  %v1006_v48 = vsel %vm996_vm14, %v989_v20, %v871_v29 }
 0x178   :  { %v545_v22 = vsel %vm541_vm11, %v532_v17, %v3912_v8  ;;  %v546_v15 = vsel %vm541_vm11, %v530_v3, %v532_v17  ;;  %v1038_v57 = vmul.f32 %v1022_v21, %v1006_v48  ;;  %v1037_v50 = vmul.f32 %v1021_v27, %v1005_v54 }
 0x179   :  { %v872_v61 = vrot.slane %v546_v15, 1  ;;  %v873_v11 = vrot.slane %v545_v22, 1  ;;  %v250_v21 = vsel %vm247_vm1, %v3812_v12, %v3810_v51  ;;  %v297_v51 = vsel %vm296_vm0, %v3824_v39, %v3193_v56 }
 0x17a   :  { %1450 = vmatprep.subr.mxu0 %v1038_v57  ;;  %v587_v12 = vrot.slane %v250_v21, 7  ;;  %v299_v56 = vsel %vm296_vm0, %v3820_v23, %v3826_v32  ;;  %v589_v54 = vrot.slane %v248_v30, 7  ;;  %v348_v39 = vsel %vm345_vm5, %v3856_v33, %v3879_v24 }
 0x17b   :  { %v1007_v45 = vsel %vm996_vm14, %v990_v34, %v872_v61  ;;  %v391_v52 = vpop.permute.xlu1 %390  ;;  %1451 = vmatpush1.msra.mxu0 %v1037_v50  ;;  %v389_v3 = vpop.permute.xlu0 %388  ;;  %v1008_v27 = vsel %vm996_vm14, %v991_v44, %v873_v11  ;;  %v637_v22 = vrot.slane %v297_v51, 6  ;;  %v909_v32 = vsel %vm894_vm3, %v200_v59, %v588_v49 }
 0x17c   :  { %v397_v41 = vsel %vm394_vm7, %v3805_v42, %v389_v3  ;;  %v1040_v9 = vmul.f32 %v1024_v14, %v1008_v27  ;;  %v1039_v36 = vmul.f32 %v1023_v53, %v1007_v45  ;;  %2782 = vmatmul.mubr.msk.f32.vlgmr.msra.gmra.mxu0 %vm1132_vm15, %v3597_v6  ;;  %v635_v15 = vrot.slane %v299_v56, 6 }
 0x17d   :  { %v730_v29 = vrot.slane %v397_v41, 4  ;;  %1626 = vmatprep.mubr.f32.mxu0 %v4327_v58  ;;  %v683_v50 = vrot.slane %v348_v39, 5  ;;  %v396_v33 = vsel %vm394_vm7, %v389_v3, %v391_v52 }
 0x17e   :  { %1521 = vmatprep.subr.mxu1 %v1040_v9  ;;  %v731_v45 = vrot.slane %v396_v33, 4  ;;  %v1027_v33 = vld [vmem:[#allocation2 + $0x70] sm:$0xff] }
 0x17f   :  { %v3942_v42 = vsel %vm945_vm10, %v3875_v31, %v730_v29  ;;  %v438_v20 = vpop.permute.xlu1 %437  ;;  %1522 = vmatpush1.msra.mxu1 %v1039_v36  ;;  %v393_v4 = vpop.permute.xlu0 %392  ;;  %v201_v31 = vsel %vm198_vm2, %v3844_v2, %v3842_v43  ;;  %v199_v2 = vsel %vm198_vm2, %v3858_v46, %v3219_v63  ;;  %v346_v43 = vsel %vm345_vm5, %v3877_v40, %v3217_v62 }
 0x180   :  { %2783 = vmatmul.mubr.msk.f32.vlgmr.msra.gmra.mxu1 %vm1132_vm15, %v3597_v6  ;;  %v908_v23 = vsel %vm894_vm3, %v201_v31, %v587_v12  ;;  %v636_v63 = vrot.slane %v298_v38, 6  ;;  %v910_v46 = vsel %vm894_vm3, %v199_v2, %v589_v54  ;;  %v347_v62 = vsel %vm345_vm5, %v3879_v24, %v3877_v40 }
 0x181   :  { %1697 = vmatprep.mubr.f32.mxu1 %v4327_v58  ;;  %v685_v57 = vrot.slane %v346_v43, 5  ;;  %v410_v1 = vsel %vm394_vm7, %v393_v4, %v3255_v13  ;;  %v925_v37 = vsel %vm911_vm4, %v908_v23, %v635_v15  ;;  %v446_v11 = vsel %vm443_vm8, %v3822_v5, %v438_v20 }
 0x182   :  { %v926_v61 = vsel %vm911_vm4, %v909_v32, %v636_v63  ;;  %v927_v40 = vsel %vm911_vm4, %v910_v46, %v637_v22  ;;  %v395_v24 = vsel %vm394_vm7, %v391_v52, %v393_v4  ;;  %v684_v44 = vrot.slane %v347_v62, 5 }
 0x183   :  { %v442_v17 = vpop.permute.xlu1 %441  ;;  %v440_v48 = vpop.permute.xlu0 %439  ;;  %v733_v3 = vrot.slane %v410_v1, 4  ;;  %v944_v27 = vsel %vm928_vm6, %v927_v40, %v685_v57  ;;  %v942_v41 = vsel %vm928_vm6, %v925_v37, %v683_v50  ;;  %v778_v9 = vrot.slane %v446_v11, 3  ;;  %v1026_v57 = vld [vmem:[#allocation2 + $0x68] sm:$0xff]  ;;  %v1028_v50 = vld [vmem:[#allocation2 + $0x78] sm:$0xff]  ;;  %v1025_v11 = vld [vmem:[#allocation2 + $0x60] sm:$0xff] }
 0x184   :  { %v459_v34 = vsel %vm443_vm8, %v442_v17, %v3299_v35  ;;  %v445_v13 = vsel %vm443_vm8, %v438_v20, %v440_v48  ;;  %v444_v5 = vsel %vm443_vm8, %v440_v48, %v442_v17  ;;  %v732_v36 = vrot.slane %v395_v24, 4 }
 0x185   :  { %v781_v35 = vrot.slane %v459_v34, 3  ;;  %v779_v29 = vrot.slane %v445_v13, 3  ;;  %v780_v4 = vrot.slane %v444_v5, 3  ;;  %v943_v51 = vsel %vm928_vm6, %v926_v61, %v684_v44 }
 0x186   :  { %v959_v31 = vsel %vm945_vm10, %v942_v41, %v731_v45  ;;  %v961_v59 = vsel %vm945_vm10, %v944_v27, %v733_v3  ;;  %v960_v43 = vsel %vm945_vm10, %v943_v51, %v732_v36  ;;  %v1063_v44 = vrot.slane %v2978_v19, %v2967_v10  ;;  %v4328_v3 = vld [vmem:[#allocation10_spill] sm:$0xff]  ;;  %v1707_v19 = vld [vmem:[#allocation4 + $0x18] sm:$0xff] }
 0x187   :  { %v489_v14 = vpop.permute.xlu1 %488  ;;  %v487_v53 = vpop.permute.xlu0 %486  ;;  %v978_v39 = vsel %vm962_vm12, %v961_v59, %v781_v35  ;;  %v977_v22 = vsel %vm962_vm12, %v960_v43, %v780_v4  ;;  %v1067_v5 = vrot.slane %v4328_v3, %v2967_v10  ;;  %v1706_v36 = vld [vmem:[#allocation4 + $0x10] sm:$0xff]  ;;  %vm2736_vm5 = vsmask.f32 0 }
 0x188   :  { %v495_v52 = vsel %vm492_vm9, %v3832_v7, %v487_v53  ;;  %v494_v21 = vsel %vm492_vm9, %v487_v53, %v489_v14  ;;  %vm2738_vm8 = vcmask 1041409  }
 0x189   :  { %v826_v49 = vrot.slane %v495_v52, 2  ;;  %v827_v38 = vrot.slane %v494_v21, 2  ;;  %v4329_v52 = vld [vmem:[#allocation9_spill] sm:$0xff] }
 0x18b   :  { %v536_v55 = vpop.permute.xlu1 %535  ;;  %v491_v20 = vpop.permute.xlu0 %490 }
 0x18c   :  { %v544_v30 = vsel %vm541_vm11, %v3912_v8, %v536_v55  ;;  %v493_v12 = vsel %vm492_vm9, %v489_v14, %v491_v20  ;;  %v508_v7 = vsel %vm492_vm9, %v491_v20, %v3484_v60  ;;  %v975_v8 = vsel %vm962_vm12, %v3942_v42, %v778_v9 }
 0x18d   :  { %v874_v56 = vrot.slane %v544_v30, 1  ;;  %v828_v2 = vrot.slane %v493_v12, 2  ;;  %v829_v54 = vrot.slane %v508_v7, 2  ;;  %v976_v60 = vsel %vm962_vm12, %v959_v31, %v779_v29  ;;  %v4330_v29 = vld [vmem:[#allocation11_spill] sm:$0xff] }
 0x18e   :  { %v992_v15 = vsel %vm979_vm13, %v975_v8, %v826_v49  ;;  %v993_v1 = vsel %vm979_vm13, %v976_v60, %v827_v38  ;;  %v1059_v21 = vrot.slane %v4330_v29, %v2967_v10  ;;  %v1704_v49 = vld [vmem:[#allocation4] sm:$0xff]  ;;  %vm2739_vm9 = vsmask.f32 1024 }
 0x18f   :  { %v540_v17 = vpop.permute.xlu1 %539  ;;  %v538_v48 = vpop.permute.xlu0 %537  ;;  %v1009_v37 = vsel %vm996_vm14, %v992_v15, %v874_v56  ;;  %v995_v61 = vsel %vm979_vm13, %v978_v39, %v829_v54  ;;  %v4072_v56 = vld [vmem:[%s4299_s5] sm:$0x1f]  ;;  %v1705_v54 = vld [vmem:[#allocation4 + $0x8] sm:$0xff] }
 0x190   :  { %v557_v23 = vsel %vm541_vm11, %v540_v17, %v3590_v18  ;;  %v542_v32 = vsel %vm541_vm11, %v538_v48, %v540_v17  ;;  %v543_v42 = vsel %vm541_vm11, %v536_v55, %v538_v48  ;;  %v994_v18 = vsel %vm979_vm13, %v977_v22, %v828_v2  ;;  %v1753_v48 = vld [vmem:[%s4300_s6] sm:$0x1f]  ;;  %v4331_v22 = vld [vmem:[#allocation13_spill] sm:$0xff]  ;;  %vm4172_vm13 = vmand %vm894_vm3, %vm2736_vm5 }
 0x191   :  { %v877_v63 = vrot.slane %v557_v23, 1  ;;  %v875_v46 = vrot.slane %v543_v42, 1  ;;  %v876_v62 = vrot.slane %v542_v32, 1  ;;  %v1041_v13 = vmul.f32 %v1025_v11, %v1009_v37  ;;  %1756 = vperm.xlu1 %2848, %v1753_v48   ;;  %v4332_v32 = vld [vmem:[#allocation14_spill] sm:$0xff]  ;;  %v1709_v11 = vld [vmem:[#allocation4 + $0x28] sm:$0xff] }
 0x192   :  { %v1071_v23 = vrot.slane %v4331_v22, %v2967_v10  ;;  %v1075_v42 = vrot.slane %v4332_v32, %v2967_v10  ;;  %vm2743_vm3 = vsmask.f32 2048 }
 0x193   :  { %v1011_v28 = vsel %vm996_vm14, %v994_v18, %v876_v62  ;;  %v1010_v14 = vsel %vm996_vm14, %v993_v1, %v875_v46  ;;  %v1012_v53 = vsel %vm996_vm14, %v995_v61, %v877_v63  ;;  %v4333_v63 = vld [vmem:[#allocation16_spill] sm:$0xff]  ;;  %vm4179_vm14 = vmand %vm2738_vm8, %vm2739_vm9  ;;  %vm2751_vm8 = vsmask.f32 4096 }
 0x194   :  { %v1042_v40 = vmul.f32 %v1026_v57, %v1010_v14  ;;  %v1044_v24 = vmul.f32 %v1028_v50, %v1012_v53  ;;  %v1043_v34 = vmul.f32 %v1027_v33, %v1011_v28  ;;  %v1079_v46 = vrot.slane %v4333_v63, %v2967_v10  ;;  %v4334_v57 = vld [vmem:[#allocation15_spill] sm:$0xff]  ;;  %v1708_v1 = vld [vmem:[#allocation4 + $0x20] sm:$0xff]  ;;  %v4336_v63 = vld [vmem:[#allocation17_spill] sm:$0xff] }
 0x195   :  { %v1083_v50 = vrot.slane %v4334_v57, %v2967_v10 }
 0x196   :  { %1592 = vmatprep.subr.mxu0 %v1042_v40  ;;  %1663 = vmatprep.subr.mxu1 %v1044_v24  ;;  %v1710_v24 = vld [vmem:[#allocation4 + $0x30] sm:$0xff] }
 0x197   :  { %1593 = vmatpush1.msra.mxu0 %v1041_v13  ;;  %1664 = vmatpush1.msra.mxu1 %v1043_v34 }
 0x198   :  { %2784 = vmatmul.mubr.msk.f32.vlgmr.msra.gmra.mxu0 %vm1132_vm15, %v3597_v6  ;;  %2785 = vmatmul.mubr.msk.f32.vlgmr.msra.gmra.mxu1 %vm1132_vm15, %v3597_v6  ;;  %v1055_v6 = vrot.slane %v4329_v52, %v2967_v10 }
 0x199   :  { %1826 = vmatprep.mubr.f32.mxu0 %v4327_v58  ;;  %1897 = vmatprep.mubr.f32.mxu1 %v4327_v58 }
 0x19c   :  { %v4057_v45 = vpop.permute.xlu0 %1049 }
 0x19d   :  { %v1118_v27 = vmul.f32 %v1063_v44, %v4057_v45  ;;  %v1119_v41 = vmul.f32 %v1067_v5, %v4057_v45  ;;  %v1116_v30 = vmul.f32 %v1055_v6, %v4057_v45  ;;  %v1117_v7 = vmul.f32 %v1059_v21, %v4057_v45  ;;  %v1711_v5 = vld [vmem:[#allocation4 + $0x38] sm:$0xff] }
 0x19e   :  { %v1120_v15 = vmul.f32 %v1071_v23, %v4057_v45  ;;  %v1121_v62 = vmul.f32 %v1075_v42, %v4057_v45  ;;  %v1122_v18 = vmul.f32 %v1079_v46, %v4057_v45  ;;  %v1123_v53 = vmul.f32 %v1083_v50, %v4057_v45 }
 0x19f   :  { %v1091_v21 = vrot.slane %v2995_v25, %v2967_v10  ;;  %v1103_v42 = vrot.slane %v3272_v16, %v2967_v10  ;;  %v1107_v46 = vrot.slane %v4336_v63, %v2967_v10 }
 0x1a1   :  { %v1128_v50 = vmul.f32 %v1103_v42, %v4057_v45  ;;  %v1129_v16 = vmul.f32 %v1107_v46, %v4057_v45  ;;  %v4338_v46 = vld [vmem:[#allocation8_spill] sm:$0xff] }
 0x1c8   :  { %v1273_v9 = vpop.f32.mrf.mxu1 }
 0x1c9   :  { %v1274_v35 = vadd.f32 %v1273_v9, %v1118_v27 }
 0x1ca   :  { %v1275_v55 = vpop.f32.mrf.mxu1 }
 0x1cb   :  { %v1276_v20 = vadd.f32 %v1275_v55, %v1119_v41  ;;  %v1722_v4 = vadd.f32 %v1706_v36, %v1274_v35  ;;  %v4335_v35 = vld [vmem:[#allocation18_spill] sm:$0xff] }
 0x1cc   :  { %v1087_v29 = vrot.slane %v4335_v35, %v2967_v10 }
 0x1cd   :  { %v1723_v12 = vadd.f32 %v1707_v19, %v1276_v20  ;;  %v1738_v51 = vmax.f32 %v1722_v4, 0.0  ;;  %v1095_v19 = vrot.slane %v3159_v47, %v2967_v10  ;;  %v1125_v20 = vmul.f32 %v1091_v21, %v4057_v45 }
 0x1ce   :  { %v1124_v55 = vmul.f32 %v1087_v29, %v4057_v45  ;;  %v1099_v4 = vrot.slane %v2999_v26, %v2967_v10 }
 0x1cf   :  { %v1202_v31 = vpop.f32.mrf.mxu0  ;;  %v1739_v59 = vmax.f32 %v1723_v12, 0.0  ;;  %v1712_v12 = vld [vmem:[#allocation4 + $0x40] sm:$0xff] }
 0x1d0   :  { %v1203_v38 = vadd.f32 %v1202_v31, %v1116_v30  ;;  %v1127_v25 = vmul.f32 %v1099_v4, %v4057_v45 }
 0x1d1   :  { %v1204_v2 = vpop.f32.mrf.mxu0  ;;  %1863 = vmatprep.subr.mxu1 %v1739_v59  ;;  %v1713_v59 = vld [vmem:[#allocation4 + $0x48] sm:$0xff] }
 0x1d2   :  { %v1205_v8 = vadd.f32 %v1204_v2, %v1117_v7  ;;  %v1720_v43 = vadd.f32 %v1704_v49, %v1203_v38  ;;  %1864 = vmatpush1.msra.mxu1 %v1738_v51  ;;  %v1126_v51 = vmul.f32 %v1095_v19, %v4057_v45 }
 0x1d3   :  { %2787 = vmatmul.mubr.msk.f32.vlgmr.msra.gmra.mxu1 %vm1132_vm15, %v4072_v56 }
 0x1d4   :  { %v1721_v39 = vadd.f32 %v1705_v54, %v1205_v8  ;;  %2039 = vmatprep.mubr.f32.mxu1 %v4327_v58  ;;  %v1736_v60 = vmax.f32 %v1720_v43, 0.0  ;;  %v1714_v54 = vld [vmem:[#allocation4 + $0x50] sm:$0xff] }
 0x1d6   :  { %v1737_v17 = vmax.f32 %v1721_v39, 0.0 }
 0x1d8   :  { %1792 = vmatprep.subr.mxu0 %v1737_v17 }
 0x1d9   :  { %1793 = vmatpush1.msra.mxu0 %v1736_v60  ;;  %v1715_v60 = vld [vmem:[#allocation4 + $0x58] sm:$0xff] }
 0x1da   :  { %2786 = vmatmul.mubr.msk.f32.vlgmr.msra.gmra.mxu0 %vm1132_vm15, %v4072_v56 }
 0x1db   :  { %1968 = vmatprep.mubr.f32.mxu0 %v4327_v58 }
 0x204   :  { %v1344_v33 = vpop.f32.mrf.mxu0 }
 0x205   :  { %v1345_v37 = vadd.f32 %v1344_v33, %v1120_v15  ;;  %v1111_v15 = vrot.slane %v3297_v0, %v2967_v10 }
 0x206   :  { %v1346_v61 = vpop.f32.mrf.mxu0 }
 0x207   :  { %v1724_v28 = vadd.f32 %v1708_v1, %v1345_v37  ;;  %v1347_v14 = vadd.f32 %v1346_v61, %v1121_v62  ;;  %v4337_v62 = vld [vmem:[#allocation12_spill] sm:$0xff]  ;;  %v1130_v33 = vmul.f32 %v1111_v15, %v4057_v45 }
 0x208   :  { %v1415_v40 = vpop.f32.mrf.mxu1  ;;  %v1115_v57 = vrot.slane %v4337_v62, %v2967_v10  ;;  %v4146_v62 = vcvt.s32.f32 %v4338_v46 }
 0x209   :  { %v1416_v34 = vadd.f32 %v1415_v40, %v1122_v18  ;;  %v1725_v13 = vadd.f32 %v1709_v11, %v1347_v14  ;;  %v1740_v44 = vmax.f32 %v1724_v28, 0.0  ;;  %v1718_v11 = vld [vmem:[#allocation4 + $0x70] sm:$0xff]  ;;  %v1717_v14 = vld [vmem:[#allocation4 + $0x68] sm:$0xff]  ;;  %v1719_v40 = vld [vmem:[#allocation4 + $0x78] sm:$0xff] }
 0x20a   :  { %v1417_v3 = vpop.f32.mrf.mxu1  ;;  %v1131_v0 = vmul.f32 %v1115_v57, %v4057_v45 }
 0x20b   :  { %v1726_v27 = vadd.f32 %v1710_v24, %v1416_v34  ;;  %v1741_v41 = vmax.f32 %v1725_v13, 0.0  ;;  %v1418_v9 = vadd.f32 %v1417_v3, %v1123_v53 }
 0x20d   :  { %v1727_v52 = vadd.f32 %v1711_v5, %v1418_v9  ;;  %1934 = vmatprep.subr.mxu0 %v1741_v41  ;;  %v1742_v6 = vmax.f32 %v1726_v27, 0.0 }
 0x20e   :  { %1935 = vmatpush1.msra.mxu0 %v1740_v44 }
 0x20f   :  { %v1743_v36 = vmax.f32 %v1727_v52, 0.0  ;;  %2788 = vmatmul.mubr.msk.f32.vlgmr.msra.gmra.mxu0 %vm1132_vm15, %v4072_v56 }
 0x210   :  { %2110 = vmatprep.mubr.f32.mxu0 %v4327_v58 }
 0x211   :  { %2005 = vmatprep.subr.mxu1 %v1743_v36 }
 0x212   :  { %2006 = vmatpush1.msra.mxu1 %v1742_v6  ;;  %v4135_v6 = vpop.permute.xlu1 %1756 }
 0x213   :  { %2789 = vmatmul.mubr.msk.f32.vlgmr.msra.gmra.mxu1 %vm1132_vm15, %v4072_v56 }
 0x214   :  { %2181 = vmatprep.mubr.f32.mxu1 %v4327_v58 }
 0x23c   :  { %v1486_v30 = vpop.f32.mrf.mxu0 }
 0x23d   :  { %v1487_v7 = vadd.f32 %v1486_v30, %v1124_v55 }
 0x23e   :  { %v1488_v31 = vpop.f32.mrf.mxu0 }
 0x23f   :  { %v1728_v49 = vadd.f32 %v1712_v12, %v1487_v7  ;;  %v1489_v38 = vadd.f32 %v1488_v31, %v1125_v20 }
 0x240   :  { %v1557_v2 = vpop.f32.mrf.mxu1 }
 0x241   :  { %v1558_v8 = vadd.f32 %v1557_v2, %v1126_v51  ;;  %v1729_v47 = vadd.f32 %v1713_v59, %v1489_v38  ;;  %v1744_v43 = vmax.f32 %v1728_v49, 0.0 }
 0x242   :  { %v1559_v39 = vpop.f32.mrf.mxu1 }
 0x243   :  { %v1730_v17 = vadd.f32 %v1714_v54, %v1558_v8  ;;  %v1745_v26 = vmax.f32 %v1729_v47, 0.0  ;;  %v1560_v48 = vadd.f32 %v1559_v39, %v1127_v25 }
 0x245   :  { %v1731_v22 = vadd.f32 %v1715_v60, %v1560_v48  ;;  %2076 = vmatprep.subr.mxu0 %v1745_v26  ;;  %v1746_v23 = vmax.f32 %v1730_v17, 0.0 }
 0x246   :  { %2077 = vmatpush1.msra.mxu0 %v1744_v43 }
 0x247   :  { %v1747_v32 = vmax.f32 %v1731_v22, 0.0  ;;  %2790 = vmatmul.mubr.msk.f32.vlgmr.msra.gmra.mxu0 %vm1132_vm15, %v4072_v56 }
 0x248   :  { %2252 = vmatprep.mubr.f32.mxu0 %v4327_v58 }
 0x249   :  { %2147 = vmatprep.subr.mxu1 %v1747_v32 }
 0x24a   :  { %2148 = vmatpush1.msra.mxu1 %v1746_v23 }
 0x24b   :  { %2791 = vmatmul.mubr.msk.f32.vlgmr.msra.gmra.mxu1 %vm1132_vm15, %v4072_v56 }
 0x24c   :  { %2323 = vmatprep.mubr.f32.mxu1 %v4327_v58  ;;  %v1716_v58 = vld [vmem:[#allocation4 + $0x60] sm:$0xff] }
 0x258   :  { %v1628_v1 = vpop.f32.mrf.mxu0  ;;  %v1699_v37 = vpop.f32.mrf.mxu1 }
 0x259   :  { %v1629_v18 = vadd.f32 %v1628_v1, %v1128_v50  ;;  %v1700_v61 = vadd.f32 %v1699_v37, %v1130_v33 }
 0x25a   :  { %v1630_v28 = vpop.f32.mrf.mxu0  ;;  %v1701_v53 = vpop.f32.mrf.mxu1 }
 0x25b   :  { %v1631_v24 = vadd.f32 %v1630_v28, %v1129_v16  ;;  %v1702_v10 = vadd.f32 %v1701_v53, %v1131_v0  ;;  %v1732_v34 = vadd.f32 %v1716_v58, %v1629_v18  ;;  %v1734_v13 = vadd.f32 %v1718_v11, %v1700_v61 }
 0x25d   :  { %v1733_v44 = vadd.f32 %v1717_v14, %v1631_v24  ;;  %v1735_v3 = vadd.f32 %v1719_v40, %v1702_v10  ;;  %v1748_v41 = vmax.f32 %v1732_v34, 0.0  ;;  %v1750_v9 = vmax.f32 %v1734_v13, 0.0 }
 0x25f   :  { %v1749_v5 = vmax.f32 %v1733_v44, 0.0  ;;  %v1751_v27 = vmax.f32 %v1735_v3, 0.0 }
 0x261   :  { %2218 = vmatprep.subr.mxu0 %v1749_v5  ;;  %2289 = vmatprep.subr.mxu1 %v1751_v27 }
 0x262   :  { %2219 = vmatpush1.msra.mxu0 %v1748_v41  ;;  %2290 = vmatpush1.msra.mxu1 %v1750_v9 }
 0x263   :  { %2792 = vmatmul.mubr.msk.f32.vlgmr.msra.gmra.mxu0 %vm1132_vm15, %v4072_v56  ;;  %2793 = vmatmul.mubr.msk.f32.vlgmr.msra.gmra.mxu1 %vm1132_vm15, %v4072_v56  ;;  %vm2742_vm15 = vcmask 1042434  }
 0x293   :  { %v1899_v45 = vpop.f32.mrf.mxu1 }
 0x294   :  { %v1900_v35 = vadd.f32 %v1899_v45, %v4135_v6 }
 0x295   :  { %v1901_v36 = vpop.f32.mrf.mxu1 }
 0x296   :  { %v1902_v21 = vadd.f32 %v1901_v36, %v4135_v6  ;;  %v2344_v20 = vsel %vm962_vm12, %v1900_v35, -inf }
 0x297   :  { %v2345_v12 = vrot.slane %v2344_v20, 4 }
 0x298   :  { %v2351_v4 = vsel %vm962_vm12, %v1902_v21, -inf }
 0x299   :  { %v2352_v7 = vrot.slane %v2351_v4, 4  ;;  %v2346_v59 = vmax.f32 %v2344_v20, %v2345_v12 }
 0x29a   :  { %v1828_v52 = vpop.f32.mrf.mxu0 }
 0x29b   :  { %v1829_v55 = vadd.f32 %v1828_v52, %v4135_v6  ;;  %v2353_v49 = vmax.f32 %v2351_v4, %v2352_v7  ;;  %v2347_v2 = vrot.slane %v2346_v59, 2 }
 0x29c   :  { %v1830_v29 = vpop.f32.mrf.mxu0 }
 0x29d   :  { %v1831_v19 = vadd.f32 %v1830_v29, %v4135_v6  ;;  %v2330_v56 = vsel %vm962_vm12, %v1829_v55, -inf  ;;  %v2354_v54 = vrot.slane %v2353_v49, 2  ;;  %v2348_v43 = vmax.f32 %v2346_v59, %v2347_v2 }
 0x29e   :  { %v2331_v51 = vrot.slane %v2330_v56, 4 }
 0x29f   :  { %v2337_v30 = vsel %vm962_vm12, %v1831_v19, -inf  ;;  %v2355_v39 = vmax.f32 %v2353_v49, %v2354_v54  ;;  %v2349_v26 = vrot.slane %v2348_v43, 1 }
 0x2a0   :  { %v2338_v31 = vrot.slane %v2337_v30, 4  ;;  %v2332_v38 = vmax.f32 %v2330_v56, %v2331_v51 }
 0x2a1   :  { %v2356_v48 = vrot.slane %v2355_v39, 1  ;;  %v2350_v32 = vmax.f32 %v2348_v43, %v2349_v26 }
 0x2a2   :  { %v2339_v25 = vmax.f32 %v2337_v30, %v2338_v31  ;;  %v2333_v8 = vrot.slane %v2332_v38, 2 }
 0x2a3   :  { %v2357_v42 = vmax.f32 %v2355_v39, %v2356_v48  ;;  %vm2447_vm0 = vcmp.ge.f32.partialorder %v1900_v35, %v2350_v32 }
 0x2a4   :  { %v2340_v47 = vrot.slane %v2339_v25, 2  ;;  %v2334_v60 = vmax.f32 %v2332_v38, %v2333_v8  ;;  %v2463_v57 = vsel %vm2447_vm0, %v4146_v62, 5.0  ;;  %vm2741_vm0 = vmor %vm4179_vm14, %vm4172_vm13  ;;  %vm2755_vm13 = vsmask.f32 5120 }
 0x2a5   :  { %vm2448_vm1 = vcmp.ge.f32.partialorder %v1902_v21, %v2357_v42  ;;  %v2491_v37 = vsel %vm962_vm12, %v2463_v57, inf }
 0x2a6   :  { %v2341_v17 = vmax.f32 %v2339_v25, %v2340_v47  ;;  %v2335_v22 = vrot.slane %v2334_v60, 1  ;;  %v2464_v50 = vsel %vm2448_vm1, %v4146_v62, 5.0  ;;  %v2492_v11 = vrot.slane %v2491_v37, 4  ;;  %vm2744_vm1 = vmand %vm2742_vm15, %vm2743_vm3 }
 0x2a7   :  { %v2498_v18 = vsel %vm962_vm12, %v2464_v50, inf  ;;  %vm4194_vm5 = vmor %vm2744_vm1, %vm2741_vm0  ;;  %vm2758_vm3 = vcmask 1046534   ;;  %vm2759_vm0 = vsmask.f32 6144 }
 0x2a8   :  { %v2342_v23 = vrot.slane %v2341_v17, 1  ;;  %v2336_v15 = vmax.f32 %v2334_v60, %v2335_v22  ;;  %v2499_v16 = vrot.slane %v2498_v18, 4  ;;  %v2493_v14 = vmin.f32 %v2491_v37, %v2492_v11 }
 0x2aa   :  { %v2343_v63 = vmax.f32 %v2341_v17, %v2342_v23  ;;  %vm2445_vm2 = vcmp.ge.f32.partialorder %v1829_v55, %v2336_v15  ;;  %v2500_v40 = vmin.f32 %v2498_v18, %v2499_v16  ;;  %v2494_v5 = vrot.slane %v2493_v14, 2 }
 0x2ab   :  { %v2461_v33 = vsel %vm2445_vm2, %v4146_v62, 5.0  ;;  %vm2746_vm2 = vcmask 1043459  }
 0x2ac   :  { %vm2446_vm4 = vcmp.ge.f32.partialorder %v1831_v19, %v2343_v63  ;;  %v2477_v58 = vsel %vm962_vm12, %v2461_v33, inf  ;;  %v2501_v9 = vrot.slane %v2500_v40, 2  ;;  %v2495_v4 = vmin.f32 %v2493_v14, %v2494_v5 }
 0x2ad   :  { %v2462_v1 = vsel %vm2446_vm4, %v4146_v62, 5.0  ;;  %v2478_v0 = vrot.slane %v2477_v58, 4  ;;  %vm2747_vm4 = vsmask.f32 3072 }
 0x2ae   :  { %v2484_v61 = vsel %vm962_vm12, %v2462_v1, inf  ;;  %v2502_v59 = vmin.f32 %v2500_v40, %v2501_v9  ;;  %v2496_v54 = vrot.slane %v2495_v4, 1 }
 0x2af   :  { %v2485_v28 = vrot.slane %v2484_v61, 4  ;;  %v2479_v10 = vmin.f32 %v2477_v58, %v2478_v0 }
 0x2b0   :  { %v2503_v26 = vrot.slane %v2502_v59, 1  ;;  %v2497_v42 = vmin.f32 %v2495_v4, %v2496_v54 }
 0x2b1   :  { %v2486_v34 = vmin.f32 %v2484_v61, %v2485_v28  ;;  %v2480_v36 = vrot.slane %v2479_v10, 2 }
 0x2b2   :  { %v2504_v37 = vmin.f32 %v2502_v59, %v2503_v26  ;;  %v2806_v14 = vtrunc.f32 %v2497_v42 }
 0x2b3   :  { %v2487_v35 = vrot.slane %v2486_v34, 2  ;;  %v2481_v51 = vmin.f32 %v2479_v10, %v2480_v36 }
 0x2b4   :  { %v2808_v10 = vtrunc.f32 %v2504_v37 }
 0x2b5   :  { %v2488_v31 = vmin.f32 %v2486_v34, %v2487_v35  ;;  %v2482_v60 = vrot.slane %v2481_v51, 1 }
 0x2b7   :  { %v2489_v17 = vrot.slane %v2488_v31, 1  ;;  %v2483_v33 = vmin.f32 %v2481_v51, %v2482_v60 }
 0x2b9   :  { %v2490_v1 = vmin.f32 %v2488_v31, %v2489_v17 }
 0x2cf   :  { %v1970_v53 = vpop.f32.mrf.mxu0 }
 0x2d0   :  { %v1971_v24 = vadd.f32 %v1970_v53, %v4135_v6 }
 0x2d1   :  { %v1972_v13 = vpop.f32.mrf.mxu0 }
 0x2d2   :  { %v1973_v44 = vadd.f32 %v1972_v13, %v4135_v6  ;;  %v2358_v3 = vsel %vm962_vm12, %v1971_v24, -inf  ;;  %v2802_v13 = vtrunc.f32 %v2483_v33 }
 0x2d3   :  { %v2041_v27 = vpop.f32.mrf.mxu1  ;;  %v2359_v41 = vrot.slane %v2358_v3, 4 }
 0x2d4   :  { %v2365_v45 = vsel %vm962_vm12, %v1973_v44, -inf  ;;  %v2042_v52 = vadd.f32 %v2041_v27, %v4135_v6 }
 0x2d5   :  { %v2360_v29 = vmax.f32 %v2358_v3, %v2359_v41  ;;  %v2366_v21 = vrot.slane %v2365_v45, 4  ;;  %v2043_v55 = vpop.f32.mrf.mxu1 }
 0x2d6   :  { %v2044_v19 = vadd.f32 %v2043_v55, %v4135_v6  ;;  %v2372_v20 = vsel %vm962_vm12, %v2042_v52, -inf }
 0x2d7   :  { %v2361_v56 = vrot.slane %v2360_v29, 2  ;;  %v2367_v30 = vmax.f32 %v2365_v45, %v2366_v21  ;;  %v2373_v12 = vrot.slane %v2372_v20, 4 }
 0x2d8   :  { %v2379_v7 = vsel %vm962_vm12, %v2044_v19, -inf }
 0x2d9   :  { %v2362_v49 = vmax.f32 %v2360_v29, %v2361_v56  ;;  %v2368_v38 = vrot.slane %v2367_v30, 2  ;;  %v2374_v25 = vmax.f32 %v2372_v20, %v2373_v12  ;;  %v2380_v2 = vrot.slane %v2379_v7, 4 }
 0x2da   :  { %v2803_v20 = vcvt.f32.s32 %v2802_v13  ;;  %v2807_v56 = vcvt.f32.s32 %v2806_v14 }
 0x2db   :  { %v2363_v8 = vrot.slane %v2362_v49, 1  ;;  %v2369_v47 = vmax.f32 %v2367_v30, %v2368_v38  ;;  %v2375_v43 = vrot.slane %v2374_v25, 2  ;;  %v2381_v39 = vmax.f32 %v2379_v7, %v2380_v2 }
 0x2dc   :  { %v2809_v30 = vcvt.f32.s32 %v2808_v10  ;;  %v2605_v54 = vpack.c.b16 %v2803_v20, %v2803_v20 }
 0x2dd   :  { %v2364_v48 = vmax.f32 %v2362_v49, %v2363_v8  ;;  %v2370_v22 = vrot.slane %v2369_v47, 1  ;;  %v2376_v23 = vmax.f32 %v2374_v25, %v2375_v43  ;;  %v2382_v32 = vrot.slane %v2381_v39, 2 }
 0x2de   :  { %v2611_v43 = vpack.c.b16 %v2809_v30, %v2809_v30 }
 0x2df   :  { %v2371_v15 = vmax.f32 %v2369_v47, %v2370_v22  ;;  %vm2449_vm6 = vcmp.ge.f32.partialorder %v1971_v24, %v2364_v48  ;;  %v2377_v63 = vrot.slane %v2376_v23, 1  ;;  %v2383_v57 = vmax.f32 %v2381_v39, %v2382_v32 }
 0x2e0   :  { %v2465_v50 = vsel %vm2449_vm6, %v4146_v62, 5.0  ;;  %v2609_v47 = vpack.c.b16 %v2807_v56, %v2807_v56  ;;  %vm4199_vm6 = vmand %vm2746_vm2, %vm2747_vm4  ;;  %vm2762_vm4 = vcmask 1047559  }
 0x2e1   :  { %vm2450_vm7 = vcmp.ge.f32.partialorder %v1973_v44, %v2371_v15  ;;  %v2505_v18 = vsel %vm962_vm12, %v2465_v50, inf  ;;  %v2378_v58 = vmax.f32 %v2376_v23, %v2377_v63  ;;  %v2384_v61 = vrot.slane %v2383_v57, 1  ;;  %vm2749_vm9 = vmor %vm4199_vm6, %vm4194_vm5 }
 0x2e2   :  { %v2466_v11 = vsel %vm2450_vm7, %v4146_v62, 5.0  ;;  %v2506_v16 = vrot.slane %v2505_v18, 4  ;;  %v2804_v44 = vtrunc.f32 %v2490_v1  ;;  %vm2750_vm7 = vcmask 1044484   ;;  %vm2760_vm2 = vmand %vm2758_vm3, %vm2759_vm0 }
 0x2e3   :  { %v2512_v0 = vsel %vm962_vm12, %v2466_v11, inf  ;;  %v2385_v28 = vmax.f32 %v2383_v57, %v2384_v61  ;;  %vm2451_vm10 = vcmp.ge.f32.partialorder %v2042_v52, %v2378_v58  ;;  %v2905_v52 = vmov 1966171168  }
 0x2e4   :  { %v2507_v53 = vmin.f32 %v2505_v18, %v2506_v16  ;;  %v2513_v40 = vrot.slane %v2512_v0, 4  ;;  %v2467_v24 = vsel %vm2451_vm10, %v4146_v62, 5.0  ;;  %v2642_v36 = vunpack.c.l.s4 %v2905_v52  ;;  %vm2752_vm10 = vmand %vm2750_vm7, %vm2751_vm8 }
 0x2e5   :  { %vm2452_vm11 = vcmp.ge.f32.partialorder %v2044_v19, %v2385_v28  ;;  %v2519_v34 = vsel %vm962_vm12, %v2467_v24, inf  ;;  %v2805_v4 = vcvt.f32.s32 %v2804_v44  ;;  %v2795_v50 = vpack.c.b8 %v2611_v43, %v2609_v47  ;;  %vm4211_vm14 = vmor %vm2752_vm10, %vm2749_vm9 }
 0x2e6   :  { %v2508_v5 = vrot.slane %v2507_v53, 2  ;;  %v2514_v27 = vmin.f32 %v2512_v0, %v2513_v40  ;;  %v2468_v41 = vsel %vm2452_vm11, %v4146_v62, 5.0  ;;  %v2520_v9 = vrot.slane %v2519_v34, 4 }
 0x2e7   :  { %v2526_v35 = vsel %vm962_vm12, %v2468_v41, inf  ;;  %v2643_v59 = vunpack.c.0.s8 %v2642_v36  ;;  %v2607_v8 = vpack.c.b16 %v2805_v4, %v2805_v4  ;;  %vm2754_vm11 = vcmask 1045509  }
 0x2e8   :  { %v2509_v29 = vmin.f32 %v2507_v53, %v2508_v5  ;;  %v2515_v21 = vrot.slane %v2514_v27, 2  ;;  %v2521_v55 = vmin.f32 %v2519_v34, %v2520_v9  ;;  %v2527_v19 = vrot.slane %v2526_v35, 4  ;;  %vm2756_vm15 = vmand %vm2754_vm11, %vm2755_vm13  ;;  %v2766_v9 = vld [vmem:[%s4301_s7] sm:$0xff] }
 0x2e9   :  { %v4204_v63 = vsub.s32 %v2643_v59, %v4338_v46  ;;  %v2794_v57 = vpack.c.b8 %v2607_v8, %v2605_v54  ;;  %vm2757_vm1 = vmor %vm2756_vm15, %vm4211_vm14  ;;  %vm2763_vm5 = vsmask.f32 7168 }
 0x2ea   :  { %v2510_v12 = vrot.slane %v2509_v29, 1  ;;  %v2516_v7 = vmin.f32 %v2514_v27, %v2515_v21  ;;  %v2522_v51 = vrot.slane %v2521_v55, 2  ;;  %v2528_v31 = vmin.f32 %v2526_v35, %v2527_v19  ;;  %vm4220_vm6 = vmor %vm2760_vm2, %vm2757_vm1 }
 0x2eb   :  { %v2654_v46 = vrot.slane %v2795_v50, %v4204_v63  ;;  %v2647_v53 = vrot.slane %v2794_v57, %v4204_v63  ;;  %vm4225_vm7 = vmand %vm2762_vm4, %vm2763_vm5 }
 0x2ec   :  { %v2511_v49 = vmin.f32 %v2509_v29, %v2510_v12  ;;  %v2517_v38 = vrot.slane %v2516_v7, 1  ;;  %v2523_v25 = vmin.f32 %v2521_v55, %v2522_v51  ;;  %v2529_v2 = vrot.slane %v2528_v31, 2  ;;  %vm2765_vm8 = vmor %vm4225_vm7, %vm4220_vm6 }
 0x2ed   :  { %v2669_v34 = vcombine.low %v2647_v53, %v2654_v46 }
 0x2ee   :  { %v2518_v60 = vmin.f32 %v2516_v7, %v2517_v38  ;;  %v2810_v17 = vtrunc.f32 %v2511_v49  ;;  %v2524_v26 = vrot.slane %v2523_v25, 1  ;;  %v2530_v48 = vmin.f32 %v2528_v31, %v2529_v2 }
 0x2ef   :  { %v2677_v5 = vrot.slane %v2669_v34, %v4204_v63 }
 0x2f0   :  { %v2811_v23 = vcvt.f32.s32 %v2810_v17  ;;  %v2812_v32 = vtrunc.f32 %v2518_v60  ;;  %v2525_v42 = vmin.f32 %v2523_v25, %v2524_v26  ;;  %v2531_v15 = vrot.slane %v2530_v48, 1 }
 0x2f2   :  { %v2813_v33 = vcvt.f32.s32 %v2812_v32  ;;  %v2613_v1 = vpack.c.b16 %v2811_v23, %v2811_v23  ;;  %v2532_v37 = vmin.f32 %v2530_v48, %v2531_v15  ;;  %v2814_v18 = vtrunc.f32 %v2525_v42 }
 0x2f4   :  { %v2615_v58 = vpack.c.b16 %v2813_v33, %v2813_v33  ;;  %v2815_v61 = vcvt.f32.s32 %v2814_v18  ;;  %v2816_v11 = vtrunc.f32 %v2532_v37 }
 0x2f6   :  { %v2796_v0 = vpack.c.b8 %v2615_v58, %v2613_v1  ;;  %v2817_v28 = vcvt.f32.s32 %v2816_v11  ;;  %v2617_v14 = vpack.c.b16 %v2815_v61, %v2815_v61 }
 0x2f8   :  { %v2619_v40 = vpack.c.b16 %v2817_v28, %v2817_v28  ;;  %v2661_v24 = vrot.slane %v2796_v0, %v4204_v63 }
 0x2fa   :  { %v2797_v10 = vpack.c.b8 %v2619_v40, %v2617_v14 }
 0x2fc   :  { %v2668_v13 = vrot.slane %v2797_v10, %v4204_v63 }
 0x2fe   :  { %v2670_v3 = vcombine.low %v2661_v24, %v2668_v13 }
 0x300   :  { %v2684_v41 = vrot.slane %v2670_v3, %v4204_v63 }
 0x302   :  { %v2685_v45 = vcombine.low %v2677_v5, %v2684_v41 }
 0x304   :  { %v2767_v52 = vsel %vm2765_vm8, %v2685_v45, %v2766_v9 }
 0x305   :  { %2768 = vst [vmem:[%s4301_s7] sm:$0xff] %v2767_v52 }
 0x307   :  { %v2112_v36 = vpop.f32.mrf.mxu0 }
 0x308   :  { %v2113_v35 = vadd.f32 %v2112_v36, %v4135_v6 }
 0x309   :  { %v2114_v29 = vpop.f32.mrf.mxu0 }
 0x30a   :  { %v2386_v21 = vsel %vm962_vm12, %v2113_v35, -inf  ;;  %v2115_v55 = vadd.f32 %v2114_v29, %v4135_v6 }
 0x30b   :  { %v2387_v19 = vrot.slane %v2386_v21, 4  ;;  %v2183_v20 = vpop.f32.mrf.mxu1 }
 0x30c   :  { %v2184_v4 = vadd.f32 %v2183_v20, %v4135_v6  ;;  %v2393_v56 = vsel %vm962_vm12, %v2115_v55, -inf }
 0x30d   :  { %v2388_v30 = vmax.f32 %v2386_v21, %v2387_v19  ;;  %v2394_v12 = vrot.slane %v2393_v56, 4  ;;  %v2185_v7 = vpop.f32.mrf.mxu1 }
 0x30e   :  { %v2400_v51 = vsel %vm962_vm12, %v2184_v4, -inf  ;;  %v2186_v31 = vadd.f32 %v2185_v7, %v4135_v6 }
 0x30f   :  { %v2389_v59 = vrot.slane %v2388_v30, 2  ;;  %v2401_v49 = vrot.slane %v2400_v51, 4  ;;  %v2395_v38 = vmax.f32 %v2393_v56, %v2394_v12 }
 0x310   :  { %v2407_v25 = vsel %vm962_vm12, %v2186_v31, -inf }
 0x311   :  { %v2390_v2 = vmax.f32 %v2388_v30, %v2389_v59  ;;  %v2402_v54 = vmax.f32 %v2400_v51, %v2401_v49  ;;  %v2396_v8 = vrot.slane %v2395_v38, 2  ;;  %v2408_v47 = vrot.slane %v2407_v25, 4 }
 0x313   :  { %v2391_v43 = vrot.slane %v2390_v2, 1  ;;  %v2403_v39 = vrot.slane %v2402_v54, 2  ;;  %v2397_v60 = vmax.f32 %v2395_v38, %v2396_v8  ;;  %v2409_v17 = vmax.f32 %v2407_v25, %v2408_v47 }
 0x315   :  { %v2392_v26 = vmax.f32 %v2390_v2, %v2391_v43  ;;  %v2404_v48 = vmax.f32 %v2402_v54, %v2403_v39  ;;  %v2398_v22 = vrot.slane %v2397_v60, 1  ;;  %v2410_v23 = vrot.slane %v2409_v17, 2 }
 0x317   :  { %vm2453_vm9 = vcmp.ge.f32.partialorder %v2113_v35, %v2392_v26  ;;  %v2405_v32 = vrot.slane %v2404_v48, 1  ;;  %v2399_v42 = vmax.f32 %v2397_v60, %v2398_v22  ;;  %v2411_v15 = vmax.f32 %v2409_v17, %v2410_v23 }
 0x318   :  { %v2469_v33 = vsel %vm2453_vm9, %v4146_v62, 5.0 }
 0x319   :  { %v2406_v57 = vmax.f32 %v2404_v48, %v2405_v32  ;;  %vm2454_vm10 = vcmp.ge.f32.partialorder %v2115_v55, %v2399_v42  ;;  %v2412_v50 = vrot.slane %v2411_v15, 1  ;;  %v2533_v58 = vsel %vm962_vm12, %v2469_v33, inf }
 0x31a   :  { %v2470_v1 = vsel %vm2454_vm10, %v4146_v62, 5.0  ;;  %v2534_v0 = vrot.slane %v2533_v58, 4 }
 0x31b   :  { %vm2455_vm11 = vcmp.ge.f32.partialorder %v2184_v4, %v2406_v57  ;;  %v2413_v37 = vmax.f32 %v2411_v15, %v2412_v50  ;;  %v2540_v61 = vsel %vm962_vm12, %v2470_v1, inf }
 0x31c   :  { %v2471_v18 = vsel %vm2455_vm11, %v4146_v62, 5.0  ;;  %v2541_v28 = vrot.slane %v2540_v61, 4  ;;  %v2535_v10 = vmin.f32 %v2533_v58, %v2534_v0 }
 0x31d   :  { %vm2456_vm13 = vcmp.ge.f32.partialorder %v2186_v31, %v2413_v37  ;;  %v2547_v46 = vsel %vm962_vm12, %v2471_v18, inf }
 0x31e   :  { %v2472_v11 = vsel %vm2456_vm13, %v4146_v62, 5.0  ;;  %v2548_v14 = vrot.slane %v2547_v46, 4  ;;  %v2542_v34 = vmin.f32 %v2540_v61, %v2541_v28  ;;  %v2536_v21 = vrot.slane %v2535_v10, 2 }
 0x31f   :  { %v2554_v16 = vsel %vm962_vm12, %v2472_v11, inf }
 0x320   :  { %v2555_v53 = vrot.slane %v2554_v16, 4  ;;  %v2549_v9 = vmin.f32 %v2547_v46, %v2548_v14  ;;  %v2543_v55 = vrot.slane %v2542_v34, 2  ;;  %v2537_v49 = vmin.f32 %v2535_v10, %v2536_v21 }
 0x322   :  { %v2556_v45 = vmin.f32 %v2554_v16, %v2555_v53  ;;  %v2550_v30 = vrot.slane %v2549_v9, 2  ;;  %v2544_v38 = vmin.f32 %v2542_v34, %v2543_v55  ;;  %v2538_v26 = vrot.slane %v2537_v49, 1 }
 0x323   :  { %v2254_v40 = vpop.f32.mrf.mxu0  ;;  %v2325_v24 = vpop.f32.mrf.mxu1 }
 0x324   :  { %v2255_v13 = vadd.f32 %v2254_v40, %v4135_v6  ;;  %v2326_v3 = vadd.f32 %v2325_v24, %v4135_v6  ;;  %v2557_v12 = vrot.slane %v2556_v45, 2  ;;  %v2551_v8 = vmin.f32 %v2549_v9, %v2550_v30 }
 0x325   :  { %v2256_v5 = vpop.f32.mrf.mxu0  ;;  %v2327_v41 = vpop.f32.mrf.mxu1  ;;  %v2545_v48 = vrot.slane %v2544_v38, 1  ;;  %v2539_v18 = vmin.f32 %v2537_v49, %v2538_v26 }
 0x326   :  { %v2414_v52 = vsel %vm962_vm12, %v2255_v13, -inf  ;;  %v2428_v36 = vsel %vm962_vm12, %v2326_v3, -inf  ;;  %v2257_v35 = vadd.f32 %v2256_v5, %v4135_v6  ;;  %v2328_v29 = vadd.f32 %v2327_v41, %v4135_v6 }
 0x327   :  { %v2415_v19 = vrot.slane %v2414_v52, 4  ;;  %v2429_v20 = vrot.slane %v2428_v36, 4  ;;  %v2558_v47 = vmin.f32 %v2556_v45, %v2557_v12  ;;  %v2552_v15 = vrot.slane %v2551_v8, 1 }
 0x328   :  { %v2421_v4 = vsel %vm962_vm12, %v2257_v35, -inf  ;;  %v2435_v56 = vsel %vm962_vm12, %v2328_v29, -inf  ;;  %v2546_v58 = vmin.f32 %v2544_v38, %v2545_v48  ;;  %v2818_v34 = vtrunc.f32 %v2539_v18 }
 0x329   :  { %v2416_v7 = vmax.f32 %v2414_v52, %v2415_v19  ;;  %v2430_v51 = vmax.f32 %v2428_v36, %v2429_v20  ;;  %v2422_v31 = vrot.slane %v2421_v4, 4  ;;  %v2436_v59 = vrot.slane %v2435_v56, 4 }
 0x32a   :  { %v2559_v57 = vrot.slane %v2558_v47, 1  ;;  %v2553_v46 = vmin.f32 %v2551_v8, %v2552_v15  ;;  %v2820_v36 = vtrunc.f32 %v2546_v58 }
 0x32b   :  { %v2417_v25 = vrot.slane %v2416_v7, 2  ;;  %v2431_v2 = vrot.slane %v2430_v51, 2  ;;  %v2423_v54 = vmax.f32 %v2421_v4, %v2422_v31  ;;  %v2437_v6 = vmax.f32 %v2435_v56, %v2436_v59 }
 0x32c   :  { %v2560_v16 = vmin.f32 %v2558_v47, %v2559_v57  ;;  %v2822_v52 = vtrunc.f32 %v2553_v46  ;;  %v2819_v4 = vcvt.f32.s32 %v2818_v34  ;;  %v2769_v34 = vld [vmem:[%s4301_s7 + $0x8] sm:$0xff] }
 0x32d   :  { %v2418_v43 = vmax.f32 %v2416_v7, %v2417_v25  ;;  %v2432_v39 = vmax.f32 %v2430_v51, %v2431_v2  ;;  %v2424_v60 = vrot.slane %v2423_v54, 2  ;;  %v2438_v17 = vrot.slane %v2437_v6, 2 }
 0x32e   :  { %v2824_v21 = vtrunc.f32 %v2560_v16  ;;  %v2823_v7 = vcvt.f32.s32 %v2822_v52  ;;  %v2821_v51 = vcvt.f32.s32 %v2820_v36  ;;  %v2621_v2 = vpack.c.b16 %v2819_v4, %v2819_v4 }
 0x32f   :  { %v2419_v22 = vrot.slane %v2418_v43, 1  ;;  %v2433_v23 = vrot.slane %v2432_v39, 1  ;;  %v2425_v32 = vmax.f32 %v2423_v54, %v2424_v60  ;;  %v2439_v42 = vmax.f32 %v2437_v6, %v2438_v17 }
 0x330   :  { %v2625_v47 = vpack.c.b16 %v2823_v7, %v2823_v7 }
 0x331   :  { %v2420_v50 = vmax.f32 %v2418_v43, %v2419_v22  ;;  %v2434_v33 = vmax.f32 %v2432_v39, %v2433_v23  ;;  %v2426_v1 = vrot.slane %v2425_v32, 1  ;;  %v2440_v37 = vrot.slane %v2439_v42, 1 }
 0x332   :  { %v2623_v43 = vpack.c.b16 %v2821_v51, %v2821_v51 }
 0x333   :  { %vm2457_vm14 = vcmp.ge.f32.partialorder %v2255_v13, %v2420_v50  ;;  %vm2459_vm15 = vcmp.ge.f32.partialorder %v2326_v3, %v2434_v33  ;;  %v2427_v61 = vmax.f32 %v2425_v32, %v2426_v1  ;;  %v2441_v11 = vmax.f32 %v2439_v42, %v2440_v37 }
 0x334   :  { %v2473_v0 = vsel %vm2457_vm14, %v4146_v62, 5.0  ;;  %v2475_v28 = vsel %vm2459_vm15, %v4146_v62, 5.0  ;;  %v2798_v42 = vpack.c.b8 %v2623_v43, %v2621_v2 }
 0x335   :  { %v2561_v14 = vsel %vm962_vm12, %v2473_v0, inf  ;;  %v2575_v53 = vsel %vm962_vm12, %v2475_v28, inf  ;;  %vm2458_vm3 = vcmp.ge.f32.partialorder %v2257_v35, %v2427_v61  ;;  %vm2460_vm0 = vcmp.ge.f32.partialorder %v2328_v29, %v2441_v11 }
 0x336   :  { %v2562_v40 = vrot.slane %v2561_v14, 4  ;;  %v2576_v24 = vrot.slane %v2575_v53, 4  ;;  %v2474_v10 = vsel %vm2458_vm3, %v4146_v62, 5.0  ;;  %v2476_v3 = vsel %vm2460_vm0, %v4146_v62, 5.0 }
 0x337   :  { %v2568_v13 = vsel %vm962_vm12, %v2474_v10, inf  ;;  %v2582_v45 = vsel %vm962_vm12, %v2476_v3, inf  ;;  %v2825_v62 = vcvt.f32.s32 %v2824_v21  ;;  %v2696_v58 = vrot.slane %v2798_v42, %v4204_v63 }
 0x338   :  { %v2563_v5 = vmin.f32 %v2561_v14, %v2562_v40  ;;  %v2577_v41 = vmin.f32 %v2575_v53, %v2576_v24  ;;  %v2569_v9 = vrot.slane %v2568_v13, 4  ;;  %v2583_v55 = vrot.slane %v2582_v45, 4 }
 0x339   :  { %v2627_v39 = vpack.c.b16 %v2825_v62, %v2825_v62 }
 0x33a   :  { %v2564_v35 = vrot.slane %v2563_v5, 2  ;;  %v2578_v29 = vrot.slane %v2577_v41, 2  ;;  %v2570_v19 = vmin.f32 %v2568_v13, %v2569_v9  ;;  %v2584_v20 = vmin.f32 %v2582_v45, %v2583_v55 }
 0x33b   :  { %v2799_v15 = vpack.c.b8 %v2627_v39, %v2625_v47 }
 0x33c   :  { %v2565_v56 = vmin.f32 %v2563_v5, %v2564_v35  ;;  %v2579_v30 = vmin.f32 %v2577_v41, %v2578_v29  ;;  %v2571_v12 = vrot.slane %v2570_v19, 2  ;;  %v2585_v31 = vrot.slane %v2584_v20, 2 }
 0x33d   :  { %v2703_v61 = vrot.slane %v2799_v15, %v4204_v63 }
 0x33e   :  { %v2566_v59 = vrot.slane %v2565_v56, 1  ;;  %v2580_v49 = vrot.slane %v2579_v30, 1  ;;  %v2572_v38 = vmin.f32 %v2570_v19, %v2571_v12  ;;  %v2586_v25 = vmin.f32 %v2584_v20, %v2585_v31 }
 0x33f   :  { %v2718_v14 = vcombine.low %v2696_v58, %v2703_v61 }
 0x340   :  { %v2567_v54 = vmin.f32 %v2565_v56, %v2566_v59  ;;  %v2581_v6 = vmin.f32 %v2579_v30, %v2580_v49  ;;  %v2573_v8 = vrot.slane %v2572_v38, 1  ;;  %v2587_v60 = vrot.slane %v2586_v25, 1 }
 0x341   :  { %v2726_v24 = vrot.slane %v2718_v14, %v4204_v63 }
 0x342   :  { %v2826_v17 = vtrunc.f32 %v2567_v54  ;;  %v2830_v26 = vtrunc.f32 %v2581_v6  ;;  %v2574_v48 = vmin.f32 %v2572_v38, %v2573_v8  ;;  %v2588_v22 = vmin.f32 %v2586_v25, %v2587_v60 }
 0x344   :  { %v2827_v23 = vcvt.f32.s32 %v2826_v17  ;;  %v2828_v32 = vtrunc.f32 %v2574_v48  ;;  %v2831_v57 = vcvt.f32.s32 %v2830_v26  ;;  %v2832_v50 = vtrunc.f32 %v2588_v22 }
 0x346   :  { %v2829_v33 = vcvt.f32.s32 %v2828_v32  ;;  %v2833_v1 = vcvt.f32.s32 %v2832_v50  ;;  %v2629_v37 = vpack.c.b16 %v2827_v23, %v2827_v23  ;;  %v2633_v11 = vpack.c.b16 %v2831_v57, %v2831_v57 }
 0x348   :  { %v2631_v18 = vpack.c.b16 %v2829_v33, %v2829_v33  ;;  %v2635_v46 = vpack.c.b16 %v2833_v1, %v2833_v1 }
 0x34a   :  { %v2800_v16 = vpack.c.b8 %v2631_v18, %v2629_v37  ;;  %v2801_v0 = vpack.c.b8 %v2635_v46, %v2633_v11 }
 0x34c   :  { %v2710_v28 = vrot.slane %v2800_v16, %v4204_v63  ;;  %v2717_v53 = vrot.slane %v2801_v0, %v4204_v63 }
 0x34e   :  { %v2719_v40 = vcombine.low %v2710_v28, %v2717_v53 }
 0x350   :  { %v2733_v10 = vrot.slane %v2719_v40, %v4204_v63 }
 0x352   :  { %v2734_v13 = vcombine.low %v2726_v24, %v2733_v10 }
 0x354   :  { %v2770_v3 = vsel %vm2765_vm8, %v2734_v13, %v2769_v34 }
 0x355   :  { %2771 = vst [vmem:[%s4301_s7 + $0x8] sm:$0xff] %v2770_v3 }
 0x356   :  { %2776 = vsyncpa [#allocation3], 1 }
 0x357   :  { %2777 = vsyncpa [#allocation5], 1 }

</bundles_post_ra>
